<compile_context>
chip_gen: v7x
topology: tpu7x:2x2x1
jax: 0.10.0
libtpu: 0.0.40
codegen_flags: <defaults>
</compile_context>

<pallas_src>
import math

import jax
import jax.numpy as jnp
from jax import lax
from jax.experimental import pallas as pl
from jax.experimental.pallas import tpu as pltpu

LN_EPS = 1e-5          # nn.LayerNorm default
NEG_INF = -1e30        # finite "-inf": safe for online-softmax running-max updates
KV_CHUNK = 512         # flash-style KV tile (clamped to T)


# ---------------- in-kernel helpers (pure jnp, traced inside the Pallas bodies) -------------

def _layernorm(x, g, b):
    mu = jnp.mean(x, axis=-1, keepdims=True)
    var = jnp.mean((x - mu) ** 2, axis=-1, keepdims=True)
    return (x - mu) * lax.rsqrt(var + LN_EPS) * g + b


def _gelu_tanh(x):
    # GELU(approximate='tanh')
    return 0.5 * x * (1.0 + jnp.tanh(0.7978845608028654 * (x + 0.044715 * x * x * x)))


# ---------------- Pallas kernels -----------------------------------------------------------

def make_blocks_kernel(n_head):
    def blocks_kernel(x_ref,
                      ln1g_ref, ln1b_ref, wqkv_ref, bqkv_ref, wo_ref, bo_ref,
                      ln2g_ref, ln2b_ref, wfc_ref, bfc_ref, wp2_ref, bp2_ref,
                      o_ref, x_acc):
        layer = pl.program_id(1)
        n_layers = pl.num_programs(1)

        @pl.when(layer == 0)
        def _():
            x_acc[...] = x_ref[0].astype(jnp.float32)

        x = x_acc[...]                                  # (T, C) fp32 residual stream
        T, C = x.shape
        H = n_head
        hd = C // H
        scale = 1.0 / math.sqrt(hd)

        # ----- attention branch: x + attn(ln_1(x)) -----
        h = _layernorm(x, ln1g_ref[0], ln1b_ref[0]).astype(jnp.bfloat16)
        qkv = jnp.dot(h, wqkv_ref[0], preferred_element_type=jnp.float32) + bqkv_ref[0]  # (T,3C) f32

        # head-batched q/k/v, 1/sqrt(hd) folded into q
        q = (qkv[:, :C] * scale).astype(jnp.bfloat16).reshape(T, H, hd)
        k = qkv[:, C:2 * C].astype(jnp.bfloat16).reshape(T, H, hd)
        v = qkv[:, 2 * C:].astype(jnp.bfloat16).reshape(T, H, hd)
        qh = pltpu.einshape("thd->htd", q)             # (H, T, hd)
        kh = pltpu.einshape("thd->htd", k)
        vh = pltpu.einshape("thd->htd", v)

        # flash-style online softmax over KV chunks, all heads batched on the MXU
        kc = min(T, KV_CHUNK)
        m_i = jnp.full((H, T, 1), NEG_INF, jnp.float32)
        l_i = jnp.zeros((H, T, 1), jnp.float32)
        acc = jnp.zeros((H, T, hd), jnp.float32)
        for lo in range(0, T, kc):                     # static chunk loop
            hi = min(T, lo + kc)
            kb = kh[:, lo:hi, :]
            vb = vh[:, lo:hi, :]
            s = jnp.einsum("hqd,hkd->hqk", qh, kb,
                           preferred_element_type=jnp.float32)          # (H, T, hi-lo)
            qi = lax.broadcasted_iota(jnp.int32, (T, hi - lo), 0)
            ki = lo + lax.broadcasted_iota(jnp.int32, (T, hi - lo), 1)
            s = jnp.where((qi >= ki)[None, :, :], s, NEG_INF)
            m_new = jnp.maximum(m_i, jnp.max(s, axis=-1, keepdims=True))
            alpha = jnp.exp(m_i - m_new)
            p = jnp.exp(s - m_new)
            l_i = alpha * l_i + jnp.sum(p, axis=-1, keepdims=True)
            acc = alpha * acc + jnp.einsum("hqk,hkd->hqd",
                                           p.astype(jnp.bfloat16), vb,
                                           preferred_element_type=jnp.float32)
            m_i = m_new
        y = acc * pl.reciprocal(l_i, approx=True)                        # (H, T, hd) f32
        y = pltpu.einshape("htd->thd", y.astype(jnp.bfloat16)).reshape(T, C)

        attn_out = jnp.dot(y, wo_ref[0], preferred_element_type=jnp.float32) + bo_ref[0]
        x = x + attn_out

        # ----- MLP branch: x + mlp(ln_2(x)) -----
        h2 = _layernorm(x, ln2g_ref[0], ln2b_ref[0]).astype(jnp.bfloat16)
        f = jnp.dot(h2, wfc_ref[0], preferred_element_type=jnp.float32) + bfc_ref[0]     # (T,4C)
        f = _gelu_tanh(f).astype(jnp.bfloat16)
        x = x + (jnp.dot(f, wp2_ref[0], preferred_element_type=jnp.float32) + bp2_ref[0])

        x_acc[...] = x

        @pl.when(layer == n_layers - 1)
        def _():
            o_ref[0] = x.astype(o_ref.dtype)

    return blocks_kernel


def head_kernel(x_ref, lng_ref, lnb_ref, wlm_ref, o_ref):
    # ln_f fused with the (vocab-tiled) lm_head
    h = _layernorm(x_ref[0].astype(jnp.float32), lng_ref[0], lnb_ref[0]).astype(jnp.bfloat16)
    o_ref[0] = jnp.dot(h, wlm_ref[...], preferred_element_type=jnp.float32).astype(o_ref.dtype)


# ---------------- wrappers ------------------------------------------------------------------

def _vmem_limit(need_bytes):
    # explicit scoped-VMEM budget: headroom over the estimated need, capped for v7x (64 MiB)
    return max(32 << 20, min(int(need_bytes * 1.5) + (4 << 20), 64 << 20))


def blocks_forward(x, blk, n_head):
    B, T, C = x.shape
    L = blk["w_qkv"].shape[0]
    weights = (blk["ln1_g"], blk["ln1_b"], blk["w_qkv"], blk["b_qkv"], blk["w_o"], blk["b_o"],
               blk["ln2_g"], blk["ln2_b"], blk["w_fc"], blk["b_fc"], blk["w_p2"], blk["b_p2"])

    def layer_spec(a):
        # one layer's slice per grid step, indexed by the sequential layer axis
        return pl.BlockSpec((1,) + a.shape[1:], lambda b, l: (l,) + (0,) * (a.ndim - 1))

    kc = min(T, KV_CHUNK)
    block_bytes = 2 * T * C * 2                                        # x in + out (bf16)
    block_bytes += sum(int(math.prod(a.shape[1:])) * a.dtype.itemsize for a in weights)
    interm = (T * C * 4                    # resident fp32 residual scratch
              + 8 * T * C * 4              # qkv / MLP-hidden fp32 temporaries
              + 3 * n_head * T * kc * 4    # score / prob tiles
              + 4 * T * C * 4)             # head-major copies / misc
    limit = _vmem_limit(2 * block_bytes + interm)

    return pl.pallas_call(
        make_blocks_kernel(n_head),
        out_shape=jax.ShapeDtypeStruct((B, T, C), jnp.bfloat16),
        grid=(B, L),
        in_specs=[pl.BlockSpec((1, T, C), lambda b, l: (b, 0, 0))]
                 + [layer_spec(a) for a in weights],
        out_specs=pl.BlockSpec((1, T, C), lambda b, l: (b, 0, 0)),
        scratch_shapes=[pltpu.VMEM((T, C), jnp.float32)],
        compiler_params=pltpu.CompilerParams(
            dimension_semantics=("parallel", "arbitrary"),
            vmem_limit_bytes=limit),
    )(x, *weights)


def head_forward(x, lng, lnb, w_lm):
    B, T, C = x.shape
    V = w_lm.shape[1]

    # pad the vocab dim to a lane-dense multiple of 128 when it is large enough to tile
    Vp = ((V + 127) // 128) * 128 if V > 128 else V
    if Vp != V:
        w_lm = jnp.pad(w_lm, ((0, 0), (0, Vp - V)))

    if Vp % 128 == 0:
        TV = min(Vp, 2048)
        while Vp % TV != 0:
            TV -= 128
    else:
        TV = Vp                                   # tiny demo vocab: whole dim (full-array block)
    nv = Vp // TV

    block_bytes = T * C * 2 + 2 * C * 4 + C * TV * 2 + T * TV * 4
    limit = _vmem_limit(2 * block_bytes + T * TV * 4 + 2 * T * C * 4)

    logits = pl.pallas_call(
        head_kernel,
        out_shape=jax.ShapeDtypeStruct((B, T, Vp), jnp.float32),
        grid=(B, nv),
        in_specs=[pl.BlockSpec((1, T, C), lambda b, v: (b, 0, 0)),
                  pl.BlockSpec(lng.shape, lambda b, v: (0, 0)),
                  pl.BlockSpec(lnb.shape, lambda b, v: (0, 0)),
                  pl.BlockSpec((C, TV), lambda b, v: (0, v))],
        out_specs=pl.BlockSpec((1, T, TV), lambda b, v: (b, 0, v)),
        compiler_params=pltpu.CompilerParams(
            dimension_semantics=("parallel", "parallel"),
            vmem_limit_bytes=limit),
    )(x, lng, lnb, w_lm)
    return logits[:, :, :V] if Vp != V else logits


# ---------------- parameter init + full forward ---------------------------------------------

def init_params(key, vocab_size, block_size, n_layer, n_embd):
    C, L = n_embd, n_layer
    keys = jax.random.split(key, 8)

    def nrm(k, shape):
        return (0.02 * jax.random.normal(k, shape, jnp.float32)).astype(jnp.bfloat16)

    return {
        "wte": nrm(keys[0], (vocab_size, C)),
        "wpe": nrm(keys[1], (block_size, C)),
        "lnf_g": jnp.ones((1, C), jnp.float32),
        "lnf_b": jnp.zeros((1, C), jnp.float32),
        "w_lm": nrm(keys[2], (C, vocab_size)),
        "blocks": {
            "ln1_g": jnp.ones((L, 1, C), jnp.float32),
            "ln1_b": jnp.zeros((L, 1, C), jnp.float32),
            "w_qkv": nrm(keys[3], (L, C, 3 * C)),
            "b_qkv": jnp.zeros((L, 1, 3 * C), jnp.float32),
            "w_o":   nrm(keys[4], (L, C, C)),
            "b_o":   jnp.zeros((L, 1, C), jnp.float32),
            "ln2_g": jnp.ones((L, 1, C), jnp.float32),
            "ln2_b": jnp.zeros((L, 1, C), jnp.float32),
            "w_fc":  nrm(keys[5], (L, C, 4 * C)),
            "b_fc":  jnp.zeros((L, 1, 4 * C), jnp.float32),
            "w_p2":  nrm(keys[6], (L, 4 * C, C)),
            "b_p2":  jnp.zeros((L, 1, C), jnp.float32),
        },
    }


def gpt_forward(idx, params, n_head):
    # layer_num == 0 and layer_num == iter-1 path: embed -> blocks -> ln_f -> lm_head
    B, T = idx.shape
    tok_emb = jnp.take(params["wte"], idx, axis=0)                 # (B, T, C)  -- glue gather
    pos_emb = params["wpe"][:T][None, :, :]                        # (1, T, C)
    x = (tok_emb.astype(jnp.float32) + pos_emb.astype(jnp.float32)).astype(jnp.bfloat16)
    x = blocks_forward(x, params["blocks"], n_head)
    logits = head_forward(x, params["lnf_g"], params["lnf_b"], params["w_lm"])
    # TODO(synk): cross-entropy loss path only runs when `target` is provided; not needed (loss=None).
    return logits, None


# ---------------- pure-JAX reference (for correctness check) --------------------------------

def _ref_forward(idx, params, n_head):
    p = jax.tree_util.tree_map(lambda a: a.astype(jnp.float32), params)
    B, T = idx.shape
    x = jnp.take(p["wte"], idx, axis=0) + p["wpe"][:T][None]
    blk = p["blocks"]
    L, C = blk["w_qkv"].shape[0], x.shape[-1]
    H, hd = n_head, C // n_head

    def ln(z, g, b):
        mu = z.mean(-1, keepdims=True)
        var = ((z - mu) ** 2).mean(-1, keepdims=True)
        return (z - mu) / jnp.sqrt(var + LN_EPS) * g + b

    mask = jnp.tril(jnp.ones((T, T), bool))
    for l in range(L):
        h = ln(x, blk["ln1_g"][l], blk["ln1_b"][l])
        qkv = h @ blk["w_qkv"][l] + blk["b_qkv"][l]
        q, k, v = jnp.split(qkv, 3, axis=-1)
        q = q.reshape(B, T, H, hd).transpose(0, 2, 1, 3)
        k = k.reshape(B, T, H, hd).transpose(0, 2, 1, 3)
        v = v.reshape(B, T, H, hd).transpose(0, 2, 1, 3)
        s = (q @ jnp.swapaxes(k, -1, -2)) / math.sqrt(hd)
        s = jnp.where(mask, s, -jnp.inf)
        w = jax.nn.softmax(s, axis=-1)
        y = (w @ v).transpose(0, 2, 1, 3).reshape(B, T, C)
        x = x + y @ blk["w_o"][l] + blk["b_o"][l]
        h2 = ln(x, blk["ln2_g"][l], blk["ln2_b"][l])
        f = h2 @ blk["w_fc"][l] + blk["b_fc"][l]
        f = 0.5 * f * (1.0 + jnp.tanh(0.7978845608028654 * (f + 0.044715 * f ** 3)))
        x = x + f @ blk["w_p2"][l] + blk["b_p2"][l]
    x = ln(x, p["lnf_g"], p["lnf_b"])
    return x @ p["w_lm"]


# ---------------- demo ------------------------------------------------------------------------

if __name__ == "__main__":
    # small config consistent with the module
    vocab_size, block_size, n_layer, n_head, n_embd = 64, 8, 2, 4, 32
    B, T = 2, 8

    key = jax.random.PRNGKey(0)
    k_params, k_idx = jax.random.split(key)
    params = init_params(k_params, vocab_size, block_size, n_layer, n_embd)
    idx = jax.random.randint(k_idx, (B, T), 0, vocab_size, dtype=jnp.int32)

    logits, loss = gpt_forward(idx, params, n_head)
    logits = jax.block_until_ready(logits)
    assert logits.shape == (B, T, vocab_size)
    assert bool(jnp.all(jnp.isfinite(logits)))

    ref = _ref_forward(idx, params, n_head)
    err = float(jnp.max(jnp.abs(logits - ref)))
    assert err < 5e-2, f"max abs err vs reference: {err}"
    print("KERNEL_OK")
</pallas_src>

<mosaic_0001>
module attributes {stable_mosaic.version = 11 : i64} {
  func.func @blocks_kernel(%arg0: i32, %arg1: i32, %arg2: memref<1x8x32xbf16, #tpu.memory_space<vmem>>, %arg3: memref<1x1x32xf32, #tpu.memory_space<vmem>>, %arg4: memref<1x1x32xf32, #tpu.memory_space<vmem>>, %arg5: memref<1x32x96xbf16, #tpu.memory_space<vmem>>, %arg6: memref<1x1x96xf32, #tpu.memory_space<vmem>>, %arg7: memref<1x32x32xbf16, #tpu.memory_space<vmem>>, %arg8: memref<1x1x32xf32, #tpu.memory_space<vmem>>, %arg9: memref<1x1x32xf32, #tpu.memory_space<vmem>>, %arg10: memref<1x1x32xf32, #tpu.memory_space<vmem>>, %arg11: memref<1x32x128xbf16, #tpu.memory_space<vmem>>, %arg12: memref<1x1x128xf32, #tpu.memory_space<vmem>>, %arg13: memref<1x128x32xbf16, #tpu.memory_space<vmem>>, %arg14: memref<1x1x32xf32, #tpu.memory_space<vmem>>, %arg15: memref<1x8x32xbf16, #tpu.memory_space<vmem>>, %arg16: memref<8x32xf32, #tpu.memory_space<vmem>>) attributes {dimension_semantics = [#tpu.dimension_semantics<parallel>, #tpu.dimension_semantics<arbitrary>], iteration_bounds = array<i64: 2, 2>, scalar_prefetch = 0 : i64, scratch_operands = 1 : i64, tpu.core_type = #tpu.core_type<tc>, window_params = [{transform_indices = @transform_0, window_bounds = array<i64: 1, 8, 32>}, {transform_indices = @transform_1, window_bounds = array<i64: 1, 1, 32>}, {transform_indices = @transform_2, window_bounds = array<i64: 1, 1, 32>}, {transform_indices = @transform_3, window_bounds = array<i64: 1, 32, 96>}, {transform_indices = @transform_4, window_bounds = array<i64: 1, 1, 96>}, {transform_indices = @transform_5, window_bounds = array<i64: 1, 32, 32>}, {transform_indices = @transform_6, window_bounds = array<i64: 1, 1, 32>}, {transform_indices = @transform_7, window_bounds = array<i64: 1, 1, 32>}, {transform_indices = @transform_8, window_bounds = array<i64: 1, 1, 32>}, {transform_indices = @transform_9, window_bounds = array<i64: 1, 32, 128>}, {transform_indices = @transform_10, window_bounds = array<i64: 1, 1, 128>}, {transform_indices = @transform_11, window_bounds = array<i64: 1, 128, 32>}, {transform_indices = @transform_12, window_bounds = array<i64: 1, 1, 32>}, {transform_indices = @transform_13, window_bounds = array<i64: 1, 8, 32>}]} {
    %c0_i32 = arith.constant 0 : i32
    %0 = arith.cmpi eq, %arg1, %c0_i32 : i32
    %1 = arith.extui %0 : i1 to i32
    %c0_i32_0 = arith.constant 0 : i32
    %2 = arith.cmpi ne, %1, %c0_i32_0 : i32
    scf.if %2 {
      %c0_68 = arith.constant 0 : index
      %c0_69 = arith.constant 0 : index
      %c0_70 = arith.constant 0 : index
      %157 = vector.load %arg2[%c0_68, %c0_69, %c0_70] : memref<1x8x32xbf16, #tpu.memory_space<vmem>>, vector<1x8x32xbf16>
      %158 = vector.shape_cast %157 : vector<1x8x32xbf16> to vector<8x32xbf16>
      %159 = arith.extf %158 : vector<8x32xbf16> to vector<8x32xf32>
      %c0_71 = arith.constant 0 : index
      %c0_72 = arith.constant 0 : index
      %160 = vector.load %arg16[%c0_71, %c0_72] : memref<8x32xf32, #tpu.memory_space<vmem>>, vector<8x32xf32>
      tpu.vector_store %arg16[%c0_71, %c0_72], %159 {strides = array<i32>} : memref<8x32xf32, #tpu.memory_space<vmem>>, vector<8x32xf32>,
    } else {
    }
    %c0 = arith.constant 0 : index
    %c0_1 = arith.constant 0 : index
    %3 = vector.load %arg16[%c0, %c0_1] : memref<8x32xf32, #tpu.memory_space<vmem>>, vector<8x32xf32>
    %c0_2 = arith.constant 0 : index
    %c0_3 = arith.constant 0 : index
    %c0_4 = arith.constant 0 : index
    %4 = vector.load %arg3[%c0_2, %c0_3, %c0_4] : memref<1x1x32xf32, #tpu.memory_space<vmem>>, vector<1x1x32xf32>
    %5 = vector.shape_cast %4 : vector<1x1x32xf32> to vector<1x32xf32>
    %c0_5 = arith.constant 0 : index
    %c0_6 = arith.constant 0 : index
    %c0_7 = arith.constant 0 : index
    %6 = vector.load %arg4[%c0_5, %c0_6, %c0_7] : memref<1x1x32xf32, #tpu.memory_space<vmem>>, vector<1x1x32xf32>
    %7 = vector.shape_cast %6 : vector<1x1x32xf32> to vector<1x32xf32>
    %cst = arith.constant dense<0.000000e+00> : vector<8xf32>
    %8 = vector.multi_reduction <add>, %3, %cst [1] : vector<8x32xf32> to vector<8xf32>
    %9 = vector.shape_cast %8 : vector<8xf32> to vector<8x1xf32>
    %cst_8 = arith.constant 3.200000e+01 : f32
    %10 = vector.broadcast %cst_8 : f32 to vector<8x1xf32>
    %11 = arith.divf %9, %10 : vector<8x1xf32>
    %12 = vector.broadcast %11 : vector<8x1xf32> to vector<8x32xf32>
    %13 = arith.subf %3, %12 : vector<8x32xf32>
    %14 = arith.mulf %13, %13 : vector<8x32xf32>
    %cst_9 = arith.constant dense<0.000000e+00> : vector<8xf32>
    %15 = vector.multi_reduction <add>, %14, %cst_9 [1] : vector<8x32xf32> to vector<8xf32>
    %16 = vector.shape_cast %15 : vector<8xf32> to vector<8x1xf32>
    %cst_10 = arith.constant 3.200000e+01 : f32
    %17 = vector.broadcast %cst_10 : f32 to vector<8x1xf32>
    %18 = arith.divf %16, %17 : vector<8x1xf32>
    %19 = vector.broadcast %11 : vector<8x1xf32> to vector<8x32xf32>
    %20 = arith.subf %3, %19 : vector<8x32xf32>
    %cst_11 = arith.constant 9.99999974E-6 : f32
    %21 = vector.broadcast %cst_11 : f32 to vector<8x1xf32>
    %22 = arith.addf %18, %21 : vector<8x1xf32>
    %23 = math.rsqrt %22 : vector<8x1xf32>
    %24 = vector.broadcast %23 : vector<8x1xf32> to vector<8x32xf32>
    %25 = arith.mulf %20, %24 : vector<8x32xf32>
    %26 = vector.broadcast %5 : vector<1x32xf32> to vector<8x32xf32>
    %27 = arith.mulf %25, %26 : vector<8x32xf32>
    %28 = vector.broadcast %7 : vector<1x32xf32> to vector<8x32xf32>
    %29 = arith.addf %27, %28 : vector<8x32xf32>
    %30 = arith.truncf %29 : vector<8x32xf32> to vector<8x32xbf16>
    %c0_12 = arith.constant 0 : index
    %c0_13 = arith.constant 0 : index
    %c0_14 = arith.constant 0 : index
    %31 = vector.load %arg5[%c0_12, %c0_13, %c0_14] : memref<1x32x96xbf16, #tpu.memory_space<vmem>>, vector<1x32x96xbf16>
    %32 = vector.shape_cast %31 : vector<1x32x96xbf16> to vector<32x96xbf16>
    %cst_15 = arith.constant dense<0.000000e+00> : vector<8x96xf32>
    %33 = tpu.matmul %30, %32, %cst_15 {dimension_numbers = #tpu.dot_dimension_numbers<[1], [0], [0], [1], [0, 0, 1, 1], [], []>} : vector<8x32xbf16>, vector<32x96xbf16>, vector<8x96xf32> -> vector<8x96xf32>
    %c0_16 = arith.constant 0 : index
    %c0_17 = arith.constant 0 : index
    %c0_18 = arith.constant 0 : index
    %34 = vector.load %arg6[%c0_16, %c0_17, %c0_18] : memref<1x1x96xf32, #tpu.memory_space<vmem>>, vector<1x1x96xf32>
    %35 = vector.shape_cast %34 : vector<1x1x96xf32> to vector<1x96xf32>
    %36 = vector.broadcast %35 : vector<1x96xf32> to vector<8x96xf32>
    %37 = arith.addf %33, %36 : vector<8x96xf32>
    %38 = vector.extract_strided_slice %37 {offsets = [0, 0], sizes = [8, 32], strides = [1, 1]} : vector<8x96xf32> to vector<8x32xf32>
    %cst_19 = arith.constant 0.353553385 : f32
    %39 = vector.broadcast %cst_19 : f32 to vector<8x32xf32>
    %40 = arith.mulf %38, %39 : vector<8x32xf32>
    %41 = arith.truncf %40 : vector<8x32xf32> to vector<8x32xbf16>
    %42 = vector.shape_cast %41 : vector<8x32xbf16> to vector<8x4x8xbf16>
    %43 = vector.extract_strided_slice %37 {offsets = [0, 32], sizes = [8, 32], strides = [1, 1]} : vector<8x96xf32> to vector<8x32xf32>
    %44 = arith.truncf %43 : vector<8x32xf32> to vector<8x32xbf16>
    %45 = vector.shape_cast %44 : vector<8x32xbf16> to vector<8x4x8xbf16>
    %46 = vector.extract_strided_slice %37 {offsets = [0, 64], sizes = [8, 32], strides = [1, 1]} : vector<8x96xf32> to vector<8x32xf32>
    %47 = arith.truncf %46 : vector<8x32xf32> to vector<8x32xbf16>
    %48 = vector.shape_cast %47 : vector<8x32xbf16> to vector<8x4x8xbf16>
    %49 = tpu.transpose %42, [1, 0, 2] : vector<8x4x8xbf16> -> vector<4x8x8xbf16>
    %50 = tpu.transpose %45, [1, 0, 2] : vector<8x4x8xbf16> -> vector<4x8x8xbf16>
    %51 = tpu.transpose %48, [1, 0, 2] : vector<8x4x8xbf16> -> vector<4x8x8xbf16>
    %cst_20 = arith.constant -1.000000e+30 : f32
    %52 = vector.broadcast %cst_20 : f32 to vector<4x8x1xf32>
    %cst_21 = arith.constant 0.000000e+00 : f32
    %53 = vector.broadcast %cst_21 : f32 to vector<4x8x1xf32>
    %cst_22 = arith.constant 0.000000e+00 : f32
    %54 = vector.broadcast %cst_22 : f32 to vector<4x8x8xf32>
    "tpu.trace_start"() <{level = 10 : i32, message = "hqd,hkd->hqk"}> : () -> ()
    %cst_23 = arith.constant dense<0.000000e+00> : vector<4x8x8xf32>
    %55 = tpu.matmul %49, %50, %cst_23 {dimension_numbers = #tpu.dot_dimension_numbers<[2], [2], [1], [1], [0, 0, 0, 1, 1, 1], [0], [0]>} : vector<4x8x8xbf16>, vector<4x8x8xbf16>, vector<4x8x8xf32> -> vector<4x8x8xf32>
    "tpu.trace_stop"() : () -> ()
    %56 = tpu.iota {dimensions = array<i32: 0>} : vector<8x8xi32>
    %57 = tpu.iota {dimensions = array<i32: 1>} : vector<8x8xi32>
    %c0_i32_24 = arith.constant 0 : i32
    %58 = vector.broadcast %c0_i32_24 : i32 to vector<8x8xi32>
    %59 = arith.addi %58, %57 : vector<8x8xi32>
    %60 = arith.cmpi sge, %56, %59 : vector<8x8xi32>
    %61 = vector.shape_cast %60 : vector<8x8xi1> to vector<1x8x8xi1>
    %cst_25 = arith.constant -1.000000e+30 : f32
    %62 = vector.shape_cast %61 : vector<1x8x8xi1> to vector<1x8x8xi1>
    %63 = vector.broadcast %62 : vector<1x8x8xi1> to vector<4x8x8xi1>
    %64 = vector.broadcast %cst_25 : f32 to vector<4x8x8xf32>
    %65 = arith.select %63, %55, %64 : vector<4x8x8xi1>, vector<4x8x8xf32>
    %cst_26 = arith.constant dense<0xFF800000> : vector<4x8xf32>
    %66 = vector.multi_reduction <maximumf>, %65, %cst_26 [2] : vector<4x8x8xf32> to vector<4x8xf32>
    %67 = vector.shape_cast %66 : vector<4x8xf32> to vector<4x8x1xf32>
    %68 = arith.maximumf %52, %67 : vector<4x8x1xf32>
    %69 = arith.subf %52, %68 : vector<4x8x1xf32>
    %70 = math.exp %69 : vector<4x8x1xf32>
    %71 = vector.broadcast %68 : vector<4x8x1xf32> to vector<4x8x8xf32>
    %72 = arith.subf %65, %71 : vector<4x8x8xf32>
    %73 = math.exp %72 : vector<4x8x8xf32>
    %74 = arith.mulf %70, %53 : vector<4x8x1xf32>
    %cst_27 = arith.constant dense<0.000000e+00> : vector<4x8xf32>
    %75 = vector.multi_reduction <add>, %73, %cst_27 [2] : vector<4x8x8xf32> to vector<4x8xf32>
    %76 = vector.shape_cast %75 : vector<4x8xf32> to vector<4x8x1xf32>
    %77 = arith.addf %74, %76 : vector<4x8x1xf32>
    %78 = vector.broadcast %70 : vector<4x8x1xf32> to vector<4x8x8xf32>
    %79 = arith.mulf %78, %54 : vector<4x8x8xf32>
    %80 = arith.truncf %73 : vector<4x8x8xf32> to vector<4x8x8xbf16>
    "tpu.trace_start"() <{level = 10 : i32, message = "hqk,hkd->hqd"}> : () -> ()
    %cst_28 = arith.constant dense<0.000000e+00> : vector<4x8x8xf32>
    %81 = tpu.matmul %80, %51, %cst_28 {dimension_numbers = #tpu.dot_dimension_numbers<[2], [1], [1], [2], [0, 0, 0, 1, 1, 2], [0], [0]>} : vector<4x8x8xbf16>, vector<4x8x8xbf16>, vector<4x8x8xf32> -> vector<4x8x8xf32>
    "tpu.trace_stop"() : () -> ()
    %82 = arith.addf %79, %81 : vector<4x8x8xf32>
    %83 = tpu.reciprocal %77 {approx = true} : vector<4x8x1xf32> -> vector<4x8x1xf32>
    %84 = vector.broadcast %83 : vector<4x8x1xf32> to vector<4x8x8xf32>
    %85 = arith.mulf %82, %84 : vector<4x8x8xf32>
    %86 = arith.truncf %85 : vector<4x8x8xf32> to vector<4x8x8xbf16>
    %87 = tpu.transpose %86, [1, 0, 2] : vector<4x8x8xbf16> -> vector<8x4x8xbf16>
    %88 = vector.shape_cast %87 : vector<8x4x8xbf16> to vector<8x32xbf16>
    %c0_29 = arith.constant 0 : index
    %c0_30 = arith.constant 0 : index
    %c0_31 = arith.constant 0 : index
    %89 = vector.load %arg7[%c0_29, %c0_30, %c0_31] : memref<1x32x32xbf16, #tpu.memory_space<vmem>>, vector<1x32x32xbf16>
    %90 = vector.shape_cast %89 : vector<1x32x32xbf16> to vector<32x32xbf16>
    %cst_32 = arith.constant dense<0.000000e+00> : vector<8x32xf32>
    %91 = tpu.matmul %88, %90, %cst_32 {dimension_numbers = #tpu.dot_dimension_numbers<[1], [0], [0], [1], [0, 0, 1, 1], [], []>} : vector<8x32xbf16>, vector<32x32xbf16>, vector<8x32xf32> -> vector<8x32xf32>
    %c0_33 = arith.constant 0 : index
    %c0_34 = arith.constant 0 : index
    %c0_35 = arith.constant 0 : index
    %92 = vector.load %arg8[%c0_33, %c0_34, %c0_35] : memref<1x1x32xf32, #tpu.memory_space<vmem>>, vector<1x1x32xf32>
    %93 = vector.shape_cast %92 : vector<1x1x32xf32> to vector<1x32xf32>
    %94 = vector.broadcast %93 : vector<1x32xf32> to vector<8x32xf32>
    %95 = arith.addf %91, %94 : vector<8x32xf32>
    %96 = arith.addf %3, %95 : vector<8x32xf32>
    %c0_36 = arith.constant 0 : index
    %c0_37 = arith.constant 0 : index
    %c0_38 = arith.constant 0 : index
    %97 = vector.load %arg9[%c0_36, %c0_37, %c0_38] : memref<1x1x32xf32, #tpu.memory_space<vmem>>, vector<1x1x32xf32>
    %98 = vector.shape_cast %97 : vector<1x1x32xf32> to vector<1x32xf32>
    %c0_39 = arith.constant 0 : index
    %c0_40 = arith.constant 0 : index
    %c0_41 = arith.constant 0 : index
    %99 = vector.load %arg10[%c0_39, %c0_40, %c0_41] : memref<1x1x32xf32, #tpu.memory_space<vmem>>, vector<1x1x32xf32>
    %100 = vector.shape_cast %99 : vector<1x1x32xf32> to vector<1x32xf32>
    %cst_42 = arith.constant dense<0.000000e+00> : vector<8xf32>
    %101 = vector.multi_reduction <add>, %96, %cst_42 [1] : vector<8x32xf32> to vector<8xf32>
    %102 = vector.shape_cast %101 : vector<8xf32> to vector<8x1xf32>
    %cst_43 = arith.constant 3.200000e+01 : f32
    %103 = vector.broadcast %cst_43 : f32 to vector<8x1xf32>
    %104 = arith.divf %102, %103 : vector<8x1xf32>
    %105 = vector.broadcast %104 : vector<8x1xf32> to vector<8x32xf32>
    %106 = arith.subf %96, %105 : vector<8x32xf32>
    %107 = arith.mulf %106, %106 : vector<8x32xf32>
    %cst_44 = arith.constant dense<0.000000e+00> : vector<8xf32>
    %108 = vector.multi_reduction <add>, %107, %cst_44 [1] : vector<8x32xf32> to vector<8xf32>
    %109 = vector.shape_cast %108 : vector<8xf32> to vector<8x1xf32>
    %cst_45 = arith.constant 3.200000e+01 : f32
    %110 = vector.broadcast %cst_45 : f32 to vector<8x1xf32>
    %111 = arith.divf %109, %110 : vector<8x1xf32>
    %112 = vector.broadcast %104 : vector<8x1xf32> to vector<8x32xf32>
    %113 = arith.subf %96, %112 : vector<8x32xf32>
    %cst_46 = arith.constant 9.99999974E-6 : f32
    %114 = vector.broadcast %cst_46 : f32 to vector<8x1xf32>
    %115 = arith.addf %111, %114 : vector<8x1xf32>
    %116 = math.rsqrt %115 : vector<8x1xf32>
    %117 = vector.broadcast %116 : vector<8x1xf32> to vector<8x32xf32>
    %118 = arith.mulf %113, %117 : vector<8x32xf32>
    %119 = vector.broadcast %98 : vector<1x32xf32> to vector<8x32xf32>
    %120 = arith.mulf %118, %119 : vector<8x32xf32>
    %121 = vector.broadcast %100 : vector<1x32xf32> to vector<8x32xf32>
    %122 = arith.addf %120, %121 : vector<8x32xf32>
    %123 = arith.truncf %122 : vector<8x32xf32> to vector<8x32xbf16>
    %c0_47 = arith.constant 0 : index
    %c0_48 = arith.constant 0 : index
    %c0_49 = arith.constant 0 : index
    %124 = vector.load %arg11[%c0_47, %c0_48, %c0_49] : memref<1x32x128xbf16, #tpu.memory_space<vmem>>, vector<1x32x128xbf16>
    %125 = vector.shape_cast %124 : vector<1x32x128xbf16> to vector<32x128xbf16>
    %cst_50 = arith.constant dense<0.000000e+00> : vector<8x128xf32>
    %126 = tpu.matmul %123, %125, %cst_50 {dimension_numbers = #tpu.dot_dimension_numbers<[1], [0], [0], [1], [0, 0, 1, 1], [], []>} : vector<8x32xbf16>, vector<32x128xbf16>, vector<8x128xf32> -> vector<8x128xf32>
    %c0_51 = arith.constant 0 : index
    %c0_52 = arith.constant 0 : index
    %c0_53 = arith.constant 0 : index
    %127 = vector.load %arg12[%c0_51, %c0_52, %c0_53] : memref<1x1x128xf32, #tpu.memory_space<vmem>>, vector<1x1x128xf32>
    %128 = vector.shape_cast %127 : vector<1x1x128xf32> to vector<1x128xf32>
    %129 = vector.broadcast %128 : vector<1x128xf32> to vector<8x128xf32>
    %130 = arith.addf %126, %129 : vector<8x128xf32>
    %cst_54 = arith.constant 5.000000e-01 : f32
    %131 = vector.broadcast %cst_54 : f32 to vector<8x128xf32>
    %132 = arith.mulf %131, %130 : vector<8x128xf32>
    %cst_55 = arith.constant 4.471500e-02 : f32
    %133 = vector.broadcast %cst_55 : f32 to vector<8x128xf32>
    %134 = arith.mulf %133, %130 : vector<8x128xf32>
    %135 = arith.mulf %134, %130 : vector<8x128xf32>
    %136 = arith.mulf %135, %130 : vector<8x128xf32>
    %137 = arith.addf %130, %136 : vector<8x128xf32>
    %cst_56 = arith.constant 0.797884583 : f32
    %138 = vector.broadcast %cst_56 : f32 to vector<8x128xf32>
    %139 = arith.mulf %138, %137 : vector<8x128xf32>
    %140 = math.tanh %139 : vector<8x128xf32>
    %cst_57 = arith.constant 1.000000e+00 : f32
    %141 = vector.broadcast %cst_57 : f32 to vector<8x128xf32>
    %142 = arith.addf %141, %140 : vector<8x128xf32>
    %143 = arith.mulf %132, %142 : vector<8x128xf32>
    %144 = arith.truncf %143 : vector<8x128xf32> to vector<8x128xbf16>
    %c0_58 = arith.constant 0 : index
    %c0_59 = arith.constant 0 : index
    %c0_60 = arith.constant 0 : index
    %145 = vector.load %arg13[%c0_58, %c0_59, %c0_60] : memref<1x128x32xbf16, #tpu.memory_space<vmem>>, vector<1x128x32xbf16>
    %146 = vector.shape_cast %145 : vector<1x128x32xbf16> to vector<128x32xbf16>
    %cst_61 = arith.constant dense<0.000000e+00> : vector<8x32xf32>
    %147 = tpu.matmul %144, %146, %cst_61 {dimension_numbers = #tpu.dot_dimension_numbers<[1], [0], [0], [1], [0, 0, 1, 1], [], []>} : vector<8x128xbf16>, vector<128x32xbf16>, vector<8x32xf32> -> vector<8x32xf32>
    %c0_62 = arith.constant 0 : index
    %c0_63 = arith.constant 0 : index
    %c0_64 = arith.constant 0 : index
    %148 = vector.load %arg14[%c0_62, %c0_63, %c0_64] : memref<1x1x32xf32, #tpu.memory_space<vmem>>, vector<1x1x32xf32>
    %149 = vector.shape_cast %148 : vector<1x1x32xf32> to vector<1x32xf32>
    %150 = vector.broadcast %149 : vector<1x32xf32> to vector<8x32xf32>
    %151 = arith.addf %147, %150 : vector<8x32xf32>
    %152 = arith.addf %96, %151 : vector<8x32xf32>
    %c0_65 = arith.constant 0 : index
    %c0_66 = arith.constant 0 : index
    %153 = vector.load %arg16[%c0_65, %c0_66] : memref<8x32xf32, #tpu.memory_space<vmem>>, vector<8x32xf32>
    tpu.vector_store %arg16[%c0_65, %c0_66], %152 {strides = array<i32>} : memref<8x32xf32, #tpu.memory_space<vmem>>, vector<8x32xf32>,
    %c1_i32 = arith.constant 1 : i32
    %154 = arith.cmpi eq, %arg1, %c1_i32 : i32
    %155 = arith.extui %154 : i1 to i32
    %c0_i32_67 = arith.constant 0 : i32
    %156 = arith.cmpi ne, %155, %c0_i32_67 : i32
    scf.if %156 {
      %157 = arith.truncf %152 : vector<8x32xf32> to vector<8x32xbf16>
      %c0_68 = arith.constant 0 : index
      %c0_69 = arith.constant 0 : index
      %c0_70 = arith.constant 0 : index
      %158 = vector.load %arg15[%c0_68, %c0_69, %c0_70] : memref<1x8x32xbf16, #tpu.memory_space<vmem>>, vector<1x8x32xbf16>
      %159 = vector.shape_cast %158 : vector<1x8x32xbf16> to vector<8x32xbf16>
      %160 = vector.shape_cast %157 : vector<8x32xbf16> to vector<1x8x32xbf16>
      tpu.vector_store %arg15[%c0_68, %c0_69, %c0_70], %160 {strides = array<i32>} : memref<1x8x32xbf16, #tpu.memory_space<vmem>>, vector<1x8x32xbf16>,
    } else {
    }
    return
  }
  func.func @transform_0(%arg0: i32, %arg1: i32) -> (i32, i32, i32) {
    %c0_i32 = arith.constant 0 : i32
    %c0_i32_0 = arith.constant 0 : i32
    %c0_i32_1 = arith.constant 0 : i32
    return %arg0, %c0_i32, %c0_i32_0 : i32, i32, i32
  }
  func.func @transform_1(%arg0: i32, %arg1: i32) -> (i32, i32, i32) {
    %c0_i32 = arith.constant 0 : i32
    %c0_i32_0 = arith.constant 0 : i32
    %c0_i32_1 = arith.constant 0 : i32
    return %arg1, %c0_i32, %c0_i32_0 : i32, i32, i32
  }
  func.func @transform_2(%arg0: i32, %arg1: i32) -> (i32, i32, i32) {
    %c0_i32 = arith.constant 0 : i32
    %c0_i32_0 = arith.constant 0 : i32
    %c0_i32_1 = arith.constant 0 : i32
    return %arg1, %c0_i32, %c0_i32_0 : i32, i32, i32
  }
  func.func @transform_3(%arg0: i32, %arg1: i32) -> (i32, i32, i32) {
    %c0_i32 = arith.constant 0 : i32
    %c0_i32_0 = arith.constant 0 : i32
    %c0_i32_1 = arith.constant 0 : i32
    return %arg1, %c0_i32, %c0_i32_0 : i32, i32, i32
  }
  func.func @transform_4(%arg0: i32, %arg1: i32) -> (i32, i32, i32) {
    %c0_i32 = arith.constant 0 : i32
    %c0_i32_0 = arith.constant 0 : i32
    %c0_i32_1 = arith.constant 0 : i32
    return %arg1, %c0_i32, %c0_i32_0 : i32, i32, i32
  }
  func.func @transform_5(%arg0: i32, %arg1: i32) -> (i32, i32, i32) {
    %c0_i32 = arith.constant 0 : i32
    %c0_i32_0 = arith.constant 0 : i32
    %c0_i32_1 = arith.constant 0 : i32
    return %arg1, %c0_i32, %c0_i32_0 : i32, i32, i32
  }
  func.func @transform_6(%arg0: i32, %arg1: i32) -> (i32, i32, i32) {
    %c0_i32 = arith.constant 0 : i32
    %c0_i32_0 = arith.constant 0 : i32
    %c0_i32_1 = arith.constant 0 : i32
    return %arg1, %c0_i32, %c0_i32_0 : i32, i32, i32
  }
  func.func @transform_7(%arg0: i32, %arg1: i32) -> (i32, i32, i32) {
    %c0_i32 = arith.constant 0 : i32
    %c0_i32_0 = arith.constant 0 : i32
    %c0_i32_1 = arith.constant 0 : i32
    return %arg1, %c0_i32, %c0_i32_0 : i32, i32, i32
  }
  func.func @transform_8(%arg0: i32, %arg1: i32) -> (i32, i32, i32) {
    %c0_i32 = arith.constant 0 : i32
    %c0_i32_0 = arith.constant 0 : i32
    %c0_i32_1 = arith.constant 0 : i32
    return %arg1, %c0_i32, %c0_i32_0 : i32, i32, i32
  }
  func.func @transform_9(%arg0: i32, %arg1: i32) -> (i32, i32, i32) {
    %c0_i32 = arith.constant 0 : i32
    %c0_i32_0 = arith.constant 0 : i32
    %c0_i32_1 = arith.constant 0 : i32
    return %arg1, %c0_i32, %c0_i32_0 : i32, i32, i32
  }
  func.func @transform_10(%arg0: i32, %arg1: i32) -> (i32, i32, i32) {
    %c0_i32 = arith.constant 0 : i32
    %c0_i32_0 = arith.constant 0 : i32
    %c0_i32_1 = arith.constant 0 : i32
    return %arg1, %c0_i32, %c0_i32_0 : i32, i32, i32
  }
  func.func @transform_11(%arg0: i32, %arg1: i32) -> (i32, i32, i32) {
    %c0_i32 = arith.constant 0 : i32
    %c0_i32_0 = arith.constant 0 : i32
    %c0_i32_1 = arith.constant 0 : i32
    return %arg1, %c0_i32, %c0_i32_0 : i32, i32, i32
  }
  func.func @transform_12(%arg0: i32, %arg1: i32) -> (i32, i32, i32) {
    %c0_i32 = arith.constant 0 : i32
    %c0_i32_0 = arith.constant 0 : i32
    %c0_i32_1 = arith.constant 0 : i32
    return %arg1, %c0_i32, %c0_i32_0 : i32, i32, i32
  }
  func.func @transform_13(%arg0: i32, %arg1: i32) -> (i32, i32, i32) {
    %c0_i32 = arith.constant 0 : i32
    %c0_i32_0 = arith.constant 0 : i32
    %c0_i32_1 = arith.constant 0 : i32
    return %arg0, %c0_i32, %c0_i32_0 : i32, i32, i32
  }
}

</mosaic_0001>

<bundles_post_ra>
// kernel: tpu_custom_call.1
= control target key start
LH: loop header
LB: loop body
LE: loop exit
PB: predicated region body
PF: predicated region fallthrough
CT: control target
= control target key end

     0   :  { %s3363_s0 = inlined_call_operand.vmem [shape: bf16[2,8,32], index: 0, kind: input, shape index: {}]   ;;  %s3364_s1 = inlined_call_operand.vmem [shape: f32[2,1,32], index: 1, kind: input, shape index: {}]   ;;  %s3365_s2 = inlined_call_operand.vmem [shape: f32[2,1,32], index: 2, kind: input, shape index: {}]   ;;  %s3366_s3 = inlined_call_operand.vmem [shape: bf16[2,32,96], index: 3, kind: input, shape index: {}]   ;;  %s3367_s4 = inlined_call_operand.vmem [shape: f32[2,1,96], index: 4, kind: input, shape index: {}]   ;;  %s3368_s5 = inlined_call_operand.vmem [shape: bf16[2,32,32], index: 5, kind: input, shape index: {}]   ;;  %s3369_s6 = inlined_call_operand.vmem [shape: f32[2,1,32], index: 6, kind: input, shape index: {}]   ;;  %s3370_s7 = inlined_call_operand.vmem [shape: f32[2,1,32], index: 7, kind: input, shape index: {}]   ;;  %s3371_s8 = inlined_call_operand.vmem [shape: f32[2,1,32], index: 8, kind: input, shape index: {}]   ;;  %s3372_s9 = inlined_call_operand.vmem [shape: bf16[2,32,128], index: 9, kind: input, shape index: {}]   ;;  %s3373_s10 = inlined_call_operand.vmem [shape: f32[2,1,128], index: 10, kind: input, shape index: {}]   ;;  %s3374_s11 = inlined_call_operand.vmem [shape: bf16[2,128,32], index: 11, kind: input, shape index: {}]   ;;  %s3375_s12 = inlined_call_operand.vmem [shape: f32[2,1,32], index: 12, kind: input, shape index: {}]   ;;  %s3376_s13 = inlined_call_operand.hbm [shape: bf16[2,8,32], index: 13, kind: output, shape index: {}]  }
   0x1   :  { %3392 = sst [smem:[#allocation19_spill]] %s3363_s0 }
   0x2   :  { %3393 = sst [smem:[#allocation20_spill]] %s3365_s2 }
   0x3   :  { %3394 = sst [smem:[#allocation21_spill]] %s3366_s3 }
   0x4   :  { %3395 = sst [smem:[#allocation22_spill]] %s3368_s5 }
   0x5   :  { %3396 = sst [smem:[#allocation23_spill]] %s3376_s13 }
   0x6   :  { %18 = vsyncpa [#allocation4], 0 }
   0x7   :  { %20 = vsyncpa [#allocation4 + $0x1], 0  ;;  %s2889_s25 = smov 0   ;;  %s2891_s26 = smov 0  }
   0x8   :  { %s2893_s27 = smov 0   ;;  %s2895_s28 = smov 0  }
   0x9   :  { %s2897_s29 = smov 0   ;;  %s2899_s30 = smov 0  }
   0xa   :  { %s2901_s14 = smov 0   ;;  %s2903_s15 = smov 0  }
   0xb LB: > { %3397 = sst [smem:[#allocation6_spill]] %s2775_s25  ;;  %s2396_s16 = sadd.s32 4294967295, %s2803_s15   ;;  %s2803_s15 = sphi %s2903_s15, %s26_s15   ;;  %s2799_s14 = sphi %s2901_s14, %s3439_s14   ;;  %s2795_s30 = sphi %s2899_s30, %s3438_s30   ;;  %s2791_s29 = sphi %s2897_s29, %s3437_s29   ;;  %s2787_s28 = sphi %s2895_s28, %s3436_s28   ;;  %s2783_s27 = sphi %s2893_s27, %s3435_s27   ;;  %s2779_s26 = sphi %s2891_s26, %s3434_s26   ;;  %s2775_s25 = sphi %s2889_s25, %s3433_s25  }
   0xc   : > { %3398 = sst [smem:[#allocation7_spill]] %s2779_s26  ;;  %s2397_s17 = sadd.s32 4294967294, %s2803_s15  }
   0xd   : > { %3399 = sst [smem:[#allocation8_spill]] %s2783_s27  ;;  %s35_s18 = sadd.s32 1, %s2795_s30 }
   0xe   : > { %3400 = sst [smem:[#allocation9_spill]] %s2787_s28  ;;  %p36_p0 = scmp.ge.s32.totalorder %s35_s18, 2 }
   0xf   : > { %3401 = sst [smem:[#allocation10_spill]] %s2791_s29  ;;  %s38_s19 = sadd.s32 1, %s2799_s14 }
  0x10   : > { %3402 = sst [smem:[#allocation11_spill]] %s2795_s30  ;;  %p393_p1 = scmp.ne.s32.totalorder %s2783_s27, %s2779_s26 }
  0x11   : > { %3403 = sst [smem:[#allocation12_spill]] %s2799_s14  ;;  %p394_p2 = scmp.eq.s32.totalorder %s2396_s16, 3 }
  0x12   : > { %3404 = sst [smem:[#allocation13_spill]] %s2803_s15  ;;  %s3441_s18 = smov (%p36_p0, %s35_s18), 0 }
  0x13   : > { %3405 = sst [smem:[#allocation14_spill]] %s3441_s18  ;;  %s3443_s19 = smov (!%p36_p0, %s38_s19), %s2799_s14 }
  0x14   : > { %p2938_p3 = por %p394_p2, %p393_p1  ;;  %p399_p4 = scmp.ne.s32.totalorder %s2779_s26, %s2775_s25 }
  0x15   : > { %p40_p5 = scmp.ge.s32.totalorder %s3443_s19, 2  ;;  %p400_p6 = scmp.eq.s32.totalorder %s2397_s17, 3 }
  0x16   : > { %s3406_s20 = scalar_select %p2938_p3, 1, 0 }
  0x17   : > { %p2400_p7 = scmp.ge.s32.totalorder %s2803_s15, 1  ;;  %p505_p8 = scmp.lt.s32.totalorder %s2803_s15, 5 }
  0x18   : > { %3407 = sst [smem:[#allocation15_spill]] %s3406_s20  ;;  %s3445_s19 = smov (%p40_p5, %s3443_s19), 0 }
  0x19   : > { %3408 = sst [smem:[#allocation16_spill]] %s3445_s19  ;;  %p2948_p9 = por %p400_p6, %p399_p4 }
  0x1a   : > { %p506_p10 = pnand %p2400_p7, %p505_p8  ;;  %s380_s22 = ssub.s32 %s2799_s14, %s3445_s19 }
  0x1b   : > { %s3409_s21 = scalar_select %p2948_p9, 1, 0 }
  0x1c   : > { %s383_s23 = sadd.s32 1, %s2783_s27  ;;  %p381_p11 = scmp.eq.s32.totalorder %s380_s22, 0 }
  0x1d   : > { %3410 = sst [smem:[#allocation17_spill]] %s3409_s21  ;;  %509 = sbr.rel (%p506_p10) target bundleno = 2675 (0xa73), region = 72 }
  0x1e   : > { %s2956_s24 = scalar_select %p381_p11, %s2783_s27, %s383_s23  }
  0x1f   : > { %s3379_s16 = sand.u32 (!%p506_p10), 1, %s2779_s26   ;;  %p592_p12 = scmp.lt.s32.totalorder (!%p506_p10), %s2791_s29, 1 }
  0x20   : > { %3411 = sst [smem:[#allocation18_spill]] %s2956_s24  ;;  %s2962_s17 = sshll.u32 (!%p506_p10), %s3379_s16, 2 }
  0x21   : > { %p596_p13 = scmp.lt.s32.totalorder (!%p506_p10), %s2787_s28, 1  ;;  %s3412_s0 = sld [smem:[#allocation19_spill]] (!%p506_p10) }
  0x22   : > { %s3414_s3 = sld [smem:[#allocation21_spill]] (!%p506_p10)  ;;  %s3415_s5 = sld [smem:[#allocation22_spill]] (!%p506_p10) }
  0x23   : > { %s591_s26 = scalar_lea.vmem (!%p506_p10), [#allocation3], %s2962_s17  ;;  %s3416_s20 = sld [smem:[#allocation9_spill]] (!%p506_p10) }
  0x24   : > { %s593_s18 = scalar_select %p592_p12, %s2791_s29, 1 }
  0x25   : > { %s2967_s30 = scalar_select %p596_p13, %s2787_s28, 1 }
  0x26   : > { %s2402_s22 = sshll.u32 %s593_s18, 2 }
  0x27   : > { %s595_s16 = scalar_lea.vmem %s3412_s0, %s2402_s22  ;;  %s2450_s13 = sshll.u32 %s2967_s30, 4 }
  0x28   : > { %s2984_s29 = scalar_lea.vmem %s3414_s3, %s2450_s13  ;;  %s2993_s0 = scalar_lea.vmem %s3415_s5, %s2450_s13 }
  0x29   : > { %s623_s3 = scalar_lea.vmem %s3371_s8, %s2967_s30  ;;  %s3010_s18 = scalar_lea.vmem %s3372_s9, %s2450_s13 }
  0x2a   : > { %s631_s19 = scalar_lea.vmem %s3373_s10, %s2967_s30  ;;  %s2453_s5 = sshll.u32 %s2967_s30, 6 }
  0x2b   : > { %s639_s25 = scalar_lea.vmem %s3375_s12, %s2967_s30  ;;  %s3024_s27 = scalar_lea.vmem %s3374_s11, %s2453_s5 }
  0x2c   : > { %p2411_p0 = scmp.ne.s32.totalorder %s3416_s20, 0 }
  0x2d   : > { %v645_v0 = vld [vmem:[%s595_s16] sm:$0xf] (!%p2411_p0)  ;;  %vm647_vm0 = vcmask (!%p2411_p0), 261120  }
  0x2e   : > { %644 = sbr.rel (%p2411_p0) target bundleno = 53 (0x35), region = 76  ;;  %v646_v1 = vunpack.c.l.bf16 (!%p2411_p0), %v645_v0 }
  0x30   : > { %648 = vst.msk [vmem:[#allocation2] sm:$0xff] (!%p2411_p0), %vm647_vm0, %v646_v1 }
  0x35 PF: > { %vm652_vm1 = vcmask 261120   ;;  %v2664_v9 = vld [vmem:[%s2984_s29] sm:$0xff]   ;;  %v2805_v10 = vmov 0.0   ;;  %vm2806_vm2 = vmmov 0   ;;  %v2665_v11 = vld [vmem:[%s2984_s29 + $0x8] sm:$0xff]   ;;  %s3417_s13 = scalar_lea.vmem %s3364_s1, %s2967_s30  ;;  %s3418_s28 = sld [smem:[#allocation20_spill]]  ;;  %v760_v36 = vlaneseq }
  0x36   : > { %2488 = vmatprep.subr.bf16.mxu0 %v2805_v10  ;;  %2492 = vmatprep.mubr.msk.bf16.mxu0 %vm2806_vm2, %v2805_v10  ;;  %v2412_v16 = vld [vmem:[%s3417_s13] ss:$0 sm:$0xff]  ;;  %s3420_s24 = scalar_lea.vmem %s3367_s4, %s2967_s30  ;;  %s2807_s15 = smov 104   ;;  %v2812_v34 = vmov 1983009808   ;;  %v2814_v57 = vmov 0  }
  0x37   : > { %v649_v2 = vld [vmem:[#allocation2] sm:$0xff]  ;;  %2489 = vmatpush3.bf16.msra.mxu0 %v2664_v9  ;;  %2508 = vmatprep.subr.bf16.mxu1 %v2805_v10  ;;  %s2808_s21 = smov 120   ;;  %s2809_s20 = smov 112   ;;  %v758_v35 = vunpack.c.l.s4 %v2812_v34  ;;  %v2813_v38 = vmov 1934713408   ;;  %v3072_v41 = vshrl.u32 %v760_v36, 7 }
  0x38   : > { %v653_v3 = vsel %vm652_vm1, %v649_v2, 0.0  ;;  %2490 = vmatprep.subr.bf16.mxu0 %v2805_v10  ;;  %2510 = vmatprep.mubr.msk.bf16.mxu1 %vm2806_vm2, %v2805_v10  ;;  %v2414_v22 = vld [vmem:[%s3420_s24] ss:$0 sm:$0xff]  ;;  %s2810_s2 = smov 96   ;;  %s2811_s5 = smov 64   ;;  %v775_v39 = vunpack.c.l.s4 %v2813_v38  ;;  %vm1266_vm3 = vcmask 64512  }
  0x39   : > { %654 = vadd.xlane.f32.xlu0 %v653_v3  ;;  %v759_v40 = vunpack.c.0.s8 %v758_v35  ;;  %vm1529_vm5 = vcmask 1043456   ;;  %s2816_s13 = smov 16   ;;  %s2817_s29 = smov 24   ;;  %vm1894_vm6 = vcmask 130048   ;;  %vm1897_vm7 = vcmask 195584  }
  0x3a   : > { %v776_v43 = vunpack.c.0.s8 %v775_v39  ;;  %s3422_s24 = scalar_lea.vmem %s3370_s7, %s2967_s30 }
  0x3b   : > { %2491 = vmatpush3.bf16.msra.mxu0 %v2665_v11  ;;  %s3419_s23 = scalar_lea.vmem %s3418_s28, %s2967_s30  ;;  %v3075_v44 = vsub.s32 %v759_v40, %v3072_v41 }
  0x3c   : > { %2496 = vmatprep.subr.bf16.mxu0 %v2805_v10  ;;  %v2413_v18 = vld [vmem:[%s3419_s23] ss:$0 sm:$0xff]  ;;  %v3079_v47 = vsub.s32 %v776_v43, %v3072_v41  ;;  %s3421_s23 = scalar_lea.vmem %s3369_s6, %s2967_s30 }
  0xc6   : > { %v655_v4 = vpop.xlane.xlu0 %654 }
  0xc7   : > { %v657_v5 = vmul.f32 0.03125, %v655_v4 }
  0xc9   : > { %v658_v6 = vsub.f32 %v649_v2, %v657_v5 }
  0xcb   : > { %v659_v7 = vmul.f32 %v658_v6, %v658_v6 }
  0xcd   : > { %v660_v8 = vsel %vm652_vm1, %v659_v7, 0.0 }
  0xce   : > { %661 = vadd.xlane.f32.xlu0 %v660_v8 }
 0x15b   : > { %v662_v12 = vpop.xlane.xlu0 %661 }
 0x15c   : > { %v663_v13 = vmul.f32 0.03125, %v662_v12 }
 0x15e   : > { %v664_v14 = vadd.f32 1e-05, %v663_v13 }
 0x160   : > { %2678 = vrsqrt.f32 %v664_v14 }
 0x16a   : > { %v2679_v15 = vpop.eup %2678 }
 0x16b   : > { %v666_v17 = vmul.f32 %v2679_v15, %v658_v6 }
 0x16d   : > { %v673_v19 = vmul.f32 %v2412_v16, %v666_v17 }
 0x16f   : > { %v680_v20 = vadd.f32 %v2413_v18, %v673_v19 }
 0x171   : > { %v681_v21 = vpack.c.bf16 %v680_v20, %v680_v20 }
 0x173   : > { %2493 = vmatmul.mubr.msk.bf16.vlgmr.msra.gmra.mrb[0].mxu0 %vm652_vm1, %v681_v21 }
 0x174   : > { %2498 = vmatprep.mubr.msk.bf16.mxu0 %vm2806_vm2, %v2805_v10 }
 0x246   : > { %v742_v23 = vpop.f32.mrb[0].mxu0 }
 0x247   : > { %v743_v24 = vadd.f32 %v2414_v22, %v742_v23  ;;  %v2494_v25 = vpop.f32.mrb[1].mxu0 }
 0x248   : > { %v745_v26 = vpop.f32.mrb[2].mxu0 }
 0x249   : > { %v748_v27 = vmul.f32 0.35355338, %v743_v24  ;;  %v856_v28 = vpack.c.bf16 %v743_v24, %v743_v24  ;;  %v2495_v29 = vpop.f32.mrb[3].mxu0 }
 0x24b   : > { %862 = vrot.lane.b32.xlu0 %v856_v28, %s2807_s15  ;;  %858 = vrot.lane.b32.xlu1 %v856_v28, %s2808_s21  ;;  %v3058_v30 = vpack.c.bf16 %v748_v27, %v748_v27 }
 0x24f   : > { %860 = vrot.lane.b32.xlu1 %v856_v28, %s2809_s20  ;;  %755 = vrot.lane.b32.xlu0 %v3058_v30, %s2807_s15 }
 0x253   : > { %864 = vrot.lane.b32.xlu1 %v856_v28, %s2810_s2  ;;  %972 = vrot.lane.b32.xlu0 %v856_v28, %s2811_s5 }
 0x2bd   : > { %v859_v31 = vpop.permute.xlu1 %858  ;;  %v3065_v33 = vpop.permute.xlu0 %862 }
 0x2be   : > { %866 = vrot.lane.b32.xlu1 %v859_v31, %s2810_s2 }
 0x2c1   : > { %v3062_v32 = vpop.permute.xlu1 %860  ;;  %v756_v55 = vpop.permute.xlu0 %755 }
 0x2c2   : > { %868 = vrot.lane.b32.xlu1 %v3062_v32, %s2810_s2  ;;  %v805_v62 = vrot.slane %v756_v55, %v3075_v44 }
 0x2c5   : > { %v865_v37 = vpop.permute.xlu1 %864 }
 0x2c6   : > { %870 = vrot.lane.b32.xlu1 %v3065_v33, %s2810_s2  ;;  %v879_v46 = vrot.slane %v865_v37, %v3075_v44 }
 0x2ca   : > { %751 = vrot.lane.b32.xlu1 %v3058_v30, %s2808_s21 }
 0x2ce   : > { %753 = vrot.lane.b32.xlu1 %v3058_v30, %s2809_s20  ;;  %s3423_s20 = sld [smem:[#allocation9_spill]] }
 0x2d2   : > { %974 = vrot.lane.b32.xlu1 %v859_v31, %s2811_s5  ;;  %v763_v31 = vrot.slane %v3058_v30, %v3075_v44 }
 0x2d4   : > { %p2445_p1 = scmp.ne.s32.totalorder %s3423_s20, 1 }
 0x2d5   : > { %vm2190_vm8 = vcmask (!%p2445_p1), 257024  }
 0x330   : > { %v867_v42 = vpop.permute.xlu1 %866 }
 0x331   : > { %v913_v56 = vrot.slane %v867_v42, %v3075_v44 }
 0x334   : > { %v869_v45 = vpop.permute.xlu1 %868 }
 0x335   : > { %v887_v48 = vrot.slane %v869_v45, %v3075_v44 }
 0x337   : > { %v888_v49 = vcombine.low %v879_v46, %v887_v48  ;;  %v889_v50 = vcombine.high %v879_v46, %v887_v48 }
 0x338   : > { %v871_v51 = vpop.permute.xlu1 %870 }
 0x339   : > { %v896_v52 = vrot.slane %v888_v49, %v3079_v47  ;;  %v903_v53 = vrot.slane %v889_v50, %v3079_v47  ;;  %v921_v54 = vrot.slane %v871_v51, %v3075_v44 }
 0x33b   : > { %v904_v58 = vcombine.high %v896_v52, %v2814_v57  ;;  %v922_v59 = vcombine.low %v913_v56, %v921_v54  ;;  %v923_v60 = vcombine.high %v913_v56, %v921_v54  ;;  %v905_v63 = vcombine.high %v903_v53, %v2814_v57 }
 0x33c   : > { %v752_v61 = vpop.permute.xlu1 %751  ;;  %v944_v3 = vshrl.u32 %v896_v52, 16  ;;  %v960_v5 = vshrl.u32 %v903_v53, 16 }
 0x33d   : > { %v797_v0 = vrot.slane %v752_v61, %v3075_v44  ;;  %v930_v1 = vrot.slane %v922_v59, %v3079_v47  ;;  %v937_v2 = vrot.slane %v923_v60, %v3079_v47  ;;  %v952_v4 = vshrl.u32 %v904_v58, 16 }
 0x33e   : > { %v968_v12 = vshrl.u32 %v905_v63, 16 }
 0x33f   : > { %v806_v6 = vcombine.low %v797_v0, %v805_v62  ;;  %v938_v7 = vcombine.high %v930_v1, %v2814_v57  ;;  %v939_v8 = vcombine.high %v937_v2, %v2814_v57  ;;  %v942_v9 = vpack.i.b16 %v930_v1, %v896_v52 }
 0x340   : > { %v945_v11 = vshrl.u32 %v930_v1, 16  ;;  %v958_v13 = vpack.i.b16 %v937_v2, %v903_v53  ;;  %v961_v14 = vshrl.u32 %v937_v2, 16  ;;  %v807_v15 = vcombine.high %v797_v0, %v805_v62  ;;  %v754_v24 = vpop.permute.xlu1 %753 }
 0x341   : > { %v950_v17 = vpack.i.b16 %v938_v7, %v904_v58  ;;  %v953_v18 = vshrl.u32 %v938_v7, 16  ;;  %v966_v19 = vpack.i.b16 %v939_v8, %v905_v63  ;;  %v969_v21 = vshrl.u32 %v939_v8, 16 }
 0x342   : > { %v946_v16 = vpack.i.b16 %v945_v11, %v944_v3  ;;  %v962_v20 = vpack.i.b16 %v961_v14, %v960_v5  ;;  %v1142_v22 = vcombine.low %v942_v9, %v958_v13  ;;  %v814_v23 = vrot.slane %v806_v6, %v3079_v47 }
 0x343   : > { %v954_v25 = vpack.i.b16 %v953_v18, %v952_v4  ;;  %v1150_v26 = vcombine.low %v950_v17, %v966_v19  ;;  %v970_v27 = vpack.i.b16 %v969_v21, %v968_v12  ;;  %v821_v29 = vrot.slane %v807_v15, %v3079_v47 }
 0x344   : > { %v1167_v28 = vcombine.low %v946_v16, %v962_v20  ;;  %v771_v34 = vrot.slane %v754_v24, %v3075_v44  ;;  %v1149_v35 = vrot.slane %v1142_v22, %v3075_v44  ;;  %v822_v38 = vcombine.high %v814_v23, %v2814_v57 }
 0x345   : > { %v1175_v37 = vcombine.low %v954_v25, %v970_v27  ;;  %v1157_v39 = vrot.slane %v1150_v26, %v3075_v44  ;;  %v823_v43 = vcombine.high %v821_v29, %v2814_v57  ;;  %v829_v49 = vshrl.u32 %v814_v23, 16 }
 0x346   : > { %v772_v40 = vcombine.low %v763_v31, %v771_v34  ;;  %v773_v42 = vcombine.high %v763_v31, %v771_v34  ;;  %v1174_v46 = vrot.slane %v1167_v28, %v3075_v44  ;;  %v837_v51 = vshrl.u32 %v822_v38, 16 }
 0x347   : > { %v1158_v45 = vcombine.low %v1149_v35, %v1157_v39  ;;  %v1182_v48 = vrot.slane %v1175_v37, %v3075_v44  ;;  %v845_v52 = vshrl.u32 %v821_v29, 16  ;;  %v853_v60 = vshrl.u32 %v823_v43, 16 }
 0x348   : > { %v780_v30 = vrot.slane %v772_v40, %v3079_v47  ;;  %v787_v50 = vrot.slane %v773_v42, %v3079_v47 }
 0x349   : > { %v1165_v53 = vrot.slane %v1158_v45, %v3079_v47  ;;  %v1183_v54 = vcombine.low %v1174_v46, %v1182_v48 }
 0x34a   : > { %v788_v55 = vcombine.high %v780_v30, %v2814_v57  ;;  %v789_v56 = vcombine.high %v787_v50, %v2814_v57  ;;  %v826_v58 = vpack.i.b16 %v814_v23, %v780_v30  ;;  %v828_v59 = vshrl.u32 %v780_v30, 16 }
 0x34b   : > { %v842_v61 = vpack.i.b16 %v821_v29, %v787_v50  ;;  %v844_v62 = vshrl.u32 %v787_v50, 16  ;;  %v1190_v63 = vrot.slane %v1183_v54, %v3079_v47  ;;  %v1166_v11 = vcombine.high %v1165_v53, %v2814_v57 }
 0x34c   : > { %v830_v0 = vpack.i.b16 %v829_v49, %v828_v59  ;;  %v834_v1 = vpack.i.b16 %v822_v38, %v788_v55  ;;  %v836_v2 = vshrl.u32 %v788_v55, 16  ;;  %v850_v3 = vpack.i.b16 %v823_v43, %v789_v56 }
 0x34d   : > { %v846_v4 = vpack.i.b16 %v845_v52, %v844_v62  ;;  %v852_v5 = vshrl.u32 %v789_v56, 16  ;;  %v1080_v6 = vcombine.low %v826_v58, %v842_v61  ;;  %v1194_v7 = vpack.i.b16 %v1190_v63, %v1165_v53 }
 0x34e   : > { %v838_v8 = vpack.i.b16 %v837_v51, %v836_v2  ;;  %v1088_v9 = vcombine.low %v834_v1, %v850_v3  ;;  %v1191_v12 = vcombine.high %v1190_v63, %v2814_v57  ;;  %v1196_v24 = vshrl.u32 %v1190_v63, 16 }
 0x34f   : > { %v854_v13 = vpack.i.b16 %v853_v60, %v852_v5  ;;  %v1105_v14 = vcombine.low %v830_v0, %v846_v4  ;;  %v1271_v15 = vsel %vm1266_vm3, %v1194_v7, 0  ;;  %v1087_v16 = vrot.slane %v1080_v6, %v3075_v44 }
 0x350   : > { %v1095_v17 = vrot.slane %v1088_v9, %v3075_v44  ;;  %2497 = vmatpush3.bf16.xpose.msra.mxu0 %v1271_v15  ;;  %v1200_v18 = vpack.i.b16 %v1191_v12, %v1166_v11  ;;  %v1195_v27 = vshrl.u32 %v1165_v53, 16  ;;  %v1202_v37 = vshrl.u32 %v1191_v12, 16 }
 0x351   : > { %v1113_v19 = vcombine.low %v838_v8, %v854_v13  ;;  %2502 = vmatprep.subr.bf16.mxu0 %v2805_v10  ;;  %v1112_v22 = vrot.slane %v1105_v14, %v3075_v44  ;;  %v1201_v40 = vshrl.u32 %v1166_v11, 16  ;;  %v1454_v51 = vand.u32 127, %v760_v36  ;;  %v973_v14 = vpop.permute.xlu0 %972 }
 0x352   : > { %v1096_v20 = vcombine.low %v1087_v16, %v1095_v17  ;;  %v1363_v21 = vsel %vm1266_vm3, %v1200_v18, 0  ;;  %v1197_v29 = vpack.i.b16 %v1196_v24, %v1195_v27 }
 0x353   : > { %v1120_v23 = vrot.slane %v1113_v19, %v3075_v44  ;;  %2509 = vmatpush3.bf16.xpose.msra.mxu1 %v1363_v21  ;;  %v1203_v45 = vpack.i.b16 %v1202_v37, %v1201_v40  ;;  %vm1455_vm4 = vcmp.ge.s32.totalorder %v3072_v41, %v1454_v51  ;;  %v987_v41 = vrot.slane %v973_v14, %v3075_v44 }
 0x354   : > { %2520 = vmatprep.subr.bf16.mxu1 %v2805_v10  ;;  %v1103_v26 = vrot.slane %v1096_v20, %v3079_v47  ;;  %v1317_v38 = vsel %vm1266_vm3, %v1197_v29, 0 }
 0x355   : > { %v1121_v25 = vcombine.low %v1112_v22, %v1120_v23  ;;  %v1409_v48 = vsel %vm1266_vm3, %v1203_v45, 0 }
 0x356   : > { %v1104_v34 = vcombine.high %v1103_v26, %v2814_v57  ;;  %v1133_v43 = vshrl.u32 %v1103_v26, 16 }
 0x357   : > { %v1128_v28 = vrot.slane %v1121_v25, %v3079_v47 }
 0x358   : > { %v1139_v30 = vshrl.u32 %v1104_v34, 16 }
 0x359   : > { %v1132_v31 = vpack.i.b16 %v1128_v28, %v1103_v26  ;;  %v1129_v35 = vcombine.high %v1128_v28, %v2814_v57  ;;  %v1134_v42 = vshrl.u32 %v1128_v28, 16 }
 0x35b   : > { %2499 = vmatmul.mubr.msk.bf16.vlgmr.msra.gmra.mrb[4].mxu0 %vm1266_vm3, %v1132_v31  ;;  %v1138_v39 = vpack.i.b16 %v1129_v35, %v1104_v34  ;;  %v1135_v46 = vpack.i.b16 %v1134_v42, %v1133_v43  ;;  %v1140_v49 = vshrl.u32 %v1129_v35, 16 }
 0x35c   : > { %2503 = vmatpush3.bf16.xpose.msra.mxu0 %v1317_v38  ;;  %2504 = vmatprep.mubr.msk.bf16.mxu0 %vm2806_vm2, %v2805_v10 }
 0x35d   : > { %2511 = vmatmul.mubr.msk.bf16.vlgmr.msra.gmra.mrb[0].mxu1 %vm1266_vm3, %v1138_v39  ;;  %2514 = vmatprep.subr.bf16.mxu0 %v2805_v10  ;;  %v1141_v50 = vpack.i.b16 %v1140_v49, %v1139_v30 }
 0x35e   : > { %2522 = vmatprep.mubr.msk.bf16.mxu1 %vm2806_vm2, %v2805_v10 }
 0x363   : > { %2505 = vmatmul.mubr.msk.bf16.vlgmr.msra.gmra.mrb[8].mxu0 %vm1266_vm3, %v1135_v46 }
 0x364   : > { %2515 = vmatpush3.bf16.xpose.msra.mxu0 %v1409_v48  ;;  %2516 = vmatprep.mubr.msk.bf16.mxu0 %vm2806_vm2, %v2805_v10 }
 0x365   : > { %2526 = vmatprep.subr.bf16.mxu0 %v2805_v10 }
 0x36b   : > { %2517 = vmatmul.mubr.msk.bf16.vlgmr.msra.gmra.mrb[12].mxu0 %vm1266_vm3, %v1141_v50 }
 0x36c   : > { %2528 = vmatprep.mubr.msk.bf16.mxu0 %vm2806_vm2, %v2805_v10 }
 0x42e   : > { %v1307_v52 = vpop.f32.mrb[4].mxu0 }
 0x42f   : > { %v1458_v53 = vsel %vm1455_vm4, %v1307_v52, -1e+30  ;;  %v2500_v54 = vpop.f32.mrb[5].mxu0 }
 0x430   : > { %v1310_v55 = vpop.f32.mrb[6].mxu0  ;;  %v1399_v56 = vpop.f32.mrb[0].mxu1  ;;  %v1462_v58 = vsel %vm1266_vm3, %v1458_v53, -inf }
 0x431   : > { %v2512_v59 = vpop.f32.mrb[1].mxu1  ;;  %1463 = vmax.xlane.f32.xlu1 %v1462_v58  ;;  %v2501_v60 = vpop.f32.mrb[7].mxu0  ;;  %v3155_v8 = vsel %vm1455_vm4, %v1399_v56, -1e+30 }
 0x432   : > { %v1402_v61 = vpop.f32.mrb[2].mxu1  ;;  %v1468_v9 = vsel %vm1266_vm3, %v3155_v8, -inf }
 0x433   : > { %v2513_v62 = vpop.f32.mrb[3].mxu1 }
 0x436   : > { %v1353_v63 = vpop.f32.mrb[8].mxu0 }
 0x437   : > { %v1459_v36 = vsel %vm1455_vm4, %v1353_v63, -1e+30  ;;  %v2506_v0 = vpop.f32.mrb[9].mxu0 }
 0x438   : > { %v1356_v1 = vpop.f32.mrb[10].mxu0  ;;  %v1465_v2 = vsel %vm1266_vm3, %v1459_v36, -inf }
 0x439   : > { %1466 = vmax.xlane.f32.xlu0 %v1465_v2  ;;  %v2507_v3 = vpop.f32.mrb[11].mxu0 }
 0x43e   : > { %v1445_v4 = vpop.f32.mrb[12].mxu0 }
 0x43f   : > { %v2518_v5 = vpop.f32.mrb[13].mxu0  ;;  %v3161_v11 = vsel %vm1455_vm4, %v1445_v4, -1e+30 }
 0x440   : > { %v1448_v6 = vpop.f32.mrb[14].mxu0  ;;  %v1471_v12 = vsel %vm1266_vm3, %v3161_v11, -inf }
 0x441   : > { %v2519_v7 = vpop.f32.mrb[15].mxu0 }
 0x442   : > { %976 = vrot.lane.b32.xlu1 %v3062_v32, %s2811_s5  ;;  %v975_v32 = vpop.permute.xlu1 %974 }
 0x443   : > { %v1021_v26 = vrot.slane %v975_v32, %v3075_v44 }
 0x44f   : > { %978 = vrot.lane.b32.xlu0 %v3065_v33, %s2811_s5 }
 0x466   : > { %1469 = vmax.xlane.f32.xlu1 %v1468_v9 }
 0x46e   : > { %1472 = vmax.xlane.f32.xlu0 %v1471_v12 }
 0x4be   : > { %v3165_v13 = vpop.xlane.xlu1 %1463 }
 0x4bf   : > { %v1474_v33 = vmax.f32 %v3165_v13, -1e+30 }
 0x4c1   : > { %v1490_v15 = vsub.f32 %v1458_v53, %v1474_v33 }
 0x4c2   : > { %v977_v16 = vpop.permute.xlu1 %976 }
 0x4c3   : > { %v1494_v17 = vmul.f32 1.442695, %v1490_v15  ;;  %v995_v18 = vrot.slane %v977_v16, %v3075_v44 }
 0x4c5   : > { %2680 = vpow2.f32 %v1494_v17  ;;  %v996_v19 = vcombine.low %v987_v41, %v995_v18  ;;  %v997_v22 = vcombine.high %v987_v41, %v995_v18 }
 0x4c6   : > { %v3172_v20 = vpop.xlane.xlu0 %1466 }
 0x4c7   : > { %v1475_v21 = vmax.f32 %v3172_v20, -1e+30  ;;  %v1004_v23 = vrot.slane %v996_v19, %v3079_v47  ;;  %v1011_v28 = vrot.slane %v997_v22, %v3079_v47 }
 0x4c9   : > { %v1491_v24 = vsub.f32 %v1459_v36, %v1475_v21  ;;  %v1012_v35 = vcombine.high %v1004_v23, %v2814_v57  ;;  %v1013_v40 = vcombine.high %v1011_v28, %v2814_v57  ;;  %v1052_v42 = vshrl.u32 %v1004_v23, 16 }
 0x4ca   : > { %v979_v25 = vpop.permute.xlu0 %978  ;;  %v1068_v43 = vshrl.u32 %v1011_v28, 16 }
 0x4cb   : > { %v1029_v27 = vrot.slane %v979_v25, %v3075_v44  ;;  %v1496_v29 = vmul.f32 1.442695, %v1491_v24  ;;  %v1060_v30 = vshrl.u32 %v1012_v35, 16  ;;  %v1076_v58 = vshrl.u32 %v1013_v40, 16 }
 0x4cd   : > { %v1030_v31 = vcombine.low %v1021_v26, %v1029_v27  ;;  %v1031_v34 = vcombine.high %v1021_v26, %v1029_v27  ;;  %2682 = vpow2.f32 %v1496_v29 }
 0x4cf   : > { %v1038_v37 = vrot.slane %v1030_v31, %v3079_v47  ;;  %v1045_v38 = vrot.slane %v1031_v34, %v3079_v47  ;;  %v2681_v39 = vpop.eup %2680 }
 0x4d0   : > { %v1506_v52 = vsel %vm1266_vm3, %v2681_v39, 0.0  ;;  %v1522_v27 = vpack.c.bf16 %v2681_v39, %v2681_v39 }
 0x4d1   : > { %v1046_v45 = vcombine.high %v1038_v37, %v2814_v57  ;;  %v1047_v46 = vcombine.high %v1045_v38, %v2814_v57  ;;  %v1050_v48 = vpack.i.b16 %v1038_v37, %v1004_v23  ;;  %v1053_v49 = vshrl.u32 %v1038_v37, 16  ;;  %1507 = vadd.xlane.f32.xlu0 %v1506_v52 }
 0x4d2   : > { %v1066_v50 = vpack.i.b16 %v1045_v38, %v1011_v28  ;;  %v1069_v51 = vshrl.u32 %v1045_v38, 16  ;;  %v1479_v52 = vsub.f32 -1e+30, %v1475_v21 }
 0x4d3   : > { %v1054_v53 = vpack.i.b16 %v1053_v49, %v1052_v42  ;;  %v1058_v54 = vpack.i.b16 %v1046_v45, %v1012_v35  ;;  %v1061_v55 = vshrl.u32 %v1046_v45, 16  ;;  %v1074_v56 = vpack.i.b16 %v1047_v46, %v1013_v40 }
 0x4d4   : > { %v1070_v59 = vpack.i.b16 %v1069_v51, %v1068_v43  ;;  %v1077_v60 = vshrl.u32 %v1047_v46, 16  ;;  %v1204_v61 = vcombine.low %v1050_v48, %v1066_v50  ;;  %v1478_v51 = vsub.f32 -1e+30, %v1474_v33 }
 0x4d5   : > { %v1062_v62 = vpack.i.b16 %v1061_v55, %v1060_v30  ;;  %v1212_v63 = vcombine.low %v1058_v54, %v1074_v56  ;;  %v1484_v54 = vmul.f32 1.442695, %v1479_v52 }
 0x4d6   : > { %v1078_v36 = vpack.i.b16 %v1077_v60, %v1076_v58  ;;  %v1229_v0 = vcombine.low %v1054_v53, %v1070_v59  ;;  %v1211_v1 = vrot.slane %v1204_v61, %v3075_v44  ;;  %v1482_v53 = vmul.f32 1.442695, %v1478_v51 }
 0x4d7   : > { %v1219_v2 = vrot.slane %v1212_v63, %v3075_v44  ;;  %v2683_v4 = vpop.eup %2682 }
 0x4d8   : > { %v1237_v3 = vcombine.low %v1062_v62, %v1078_v36  ;;  %v1509_v6 = vsel %vm1266_vm3, %v2683_v4, 0.0  ;;  %v1236_v7 = vrot.slane %v1229_v0, %v3075_v44  ;;  %v1523_v31 = vpack.c.bf16 %v2683_v4, %v2683_v4 }
 0x4d9   : > { %v1220_v5 = vcombine.low %v1211_v1, %v1219_v2  ;;  %1510 = vadd.xlane.f32.xlu1 %v1509_v6 }
 0x4da   : > { %v1244_v9 = vrot.slane %v1237_v3, %v3075_v44 }
 0x4db   : > { %v1227_v12 = vrot.slane %v1220_v5, %v3079_v47 }
 0x4dc   : > { %v1245_v32 = vcombine.low %v1236_v7, %v1244_v9 }
 0x4dd   : > { %v1228_v14 = vcombine.high %v1227_v12, %v2814_v57  ;;  %v1257_v17 = vshrl.u32 %v1227_v12, 16 }
 0x4de   : > { %v1252_v15 = vrot.slane %v1245_v32, %v3079_v47 }
 0x4df   : > { %v1263_v19 = vshrl.u32 %v1228_v14, 16 }
 0x4e0   : > { %v1256_v16 = vpack.i.b16 %v1252_v15, %v1227_v12  ;;  %v1258_v18 = vshrl.u32 %v1252_v15, 16  ;;  %v1253_v41 = vcombine.high %v1252_v15, %v2814_v57 }
 0x4e2   : > { %v1531_v22 = vsel %vm1529_vm5, %v1256_v16, 0  ;;  %v1259_v23 = vpack.i.b16 %v1258_v18, %v1257_v17  ;;  %v1262_v24 = vpack.i.b16 %v1253_v41, %v1228_v14  ;;  %v1264_v25 = vshrl.u32 %v1253_v41, 16 }
 0x4e3   : > { %2521 = vmatpush3.bf16.msra.mxu1 %v1531_v22 }
 0x4e4   : > { %v1577_v26 = vsel %vm1529_vm5, %v1259_v23, 0  ;;  %2532 = vmatprep.subr.bf16.mxu1 %v2805_v10  ;;  %v1265_v28 = vpack.i.b16 %v1264_v25, %v1263_v19  ;;  %v1623_v29 = vsel %vm1529_vm5, %v1262_v24, 0 }
 0x4e5   : > { %2527 = vmatpush3.bf16.msra.mxu0 %v1577_v26 }
 0x4e6   : > { %2523 = vmatmul.mubr.msk.bf16.vlgmr.msra.gmra.mrb[4].mxu1 %vm1266_vm3, %v1522_v27  ;;  %2538 = vmatprep.subr.bf16.mxu0 %v2805_v10  ;;  %v1669_v34 = vsel %vm1529_vm5, %v1265_v28, 0 }
 0x4e7   : > { %2533 = vmatpush3.bf16.msra.mxu1 %v1623_v29  ;;  %2534 = vmatprep.mubr.msk.bf16.mxu1 %vm2806_vm2, %v2805_v10 }
 0x4e8   : > { %2529 = vmatmul.mubr.msk.bf16.vlgmr.msra.gmra.mrb[16].mxu0 %vm1266_vm3, %v1523_v31  ;;  %2544 = vmatprep.subr.bf16.mxu1 %v2805_v10 }
 0x4e9   : > { %2539 = vmatpush3.bf16.msra.mxu0 %v1669_v34  ;;  %2540 = vmatprep.mubr.msk.bf16.mxu0 %vm2806_vm2, %v2805_v10 }
 0x4ea   : > { %2552 = vmatprep.subr.bf16.mxu0 %v2805_v10 }
 0x4f3   : > { %v1470_v35 = vpop.xlane.xlu1 %1469 }
 0x4f4   : > { %v1476_v37 = vmax.f32 %v1470_v35, -1e+30 }
 0x4f6   : > { %v1492_v38 = vsub.f32 %v3155_v8, %v1476_v37  ;;  %v1480_v36 = vsub.f32 -1e+30, %v1476_v37 }
 0x4f8   : > { %v1498_v39 = vmul.f32 1.442695, %v1492_v38  ;;  %v1486_v2 = vmul.f32 1.442695, %v1480_v36 }
 0x4fa   : > { %2684 = vpow2.f32 %v1498_v39 }
 0x4fb   : > { %v1473_v40 = vpop.xlane.xlu0 %1472 }
 0x4fc   : > { %v1477_v42 = vmax.f32 %v1473_v40, -1e+30 }
 0x4fe   : > { %v1493_v43 = vsub.f32 %v3161_v11, %v1477_v42  ;;  %v2666_v11 = vld [vmem:[%s2993_s0] sm:$0xff]   ;;  %v1481_v14 = vsub.f32 -1e+30, %v1477_v42 }
 0x500   : > { %v1500_v45 = vmul.f32 1.442695, %v1493_v43  ;;  %v1488_v15 = vmul.f32 1.442695, %v1481_v14 }
 0x502   : > { %2686 = vpow2.f32 %v1500_v45 }
 0x503   : > { %2688 = vpow2.f32 %v1482_v53 }
 0x504   : > { %v2685_v46 = vpop.eup %2684  ;;  %2690 = vpow2.f32 %v1484_v54 }
 0x505   : > { %v1512_v48 = vsel %vm1266_vm3, %v2685_v46, 0.0  ;;  %v1524_v49 = vpack.c.bf16 %v2685_v46, %v2685_v46 }
 0x506   : > { %1513 = vadd.xlane.f32.xlu0 %v1512_v48 }
 0x507   : > { %2535 = vmatmul.mubr.msk.bf16.vlgmr.msra.gmra.mrb[8].mxu1 %vm1266_vm3, %v1524_v49 }
 0x508   : > { %2548 = vmatprep.mubr.msk.bf16.mxu1 %vm2806_vm2, %v2805_v10  ;;  %2545 = vmatpush3.bf16.msra.mxu1 %v2666_v11 }
 0x509   : > { %2546 = vmatprep.subr.bf16.mxu1 %v2805_v10 }
 0x50c   : > { %v2687_v8 = vpop.eup %2686 }
 0x50d   : > { %v1515_v30 = vsel %vm1266_vm3, %v2687_v8, 0.0  ;;  %v1525_v50 = vpack.c.bf16 %v2687_v8, %v2687_v8  ;;  %v2689_v55 = vpop.eup %2688 }
 0x50e   : > { %1516 = vadd.xlane.f32.xlu1 %v1515_v30  ;;  %v2691_v56 = vpop.eup %2690  ;;  %v1502_v59 = vmul.f32 0.0, %v2689_v55 }
 0x50f   : > { %2541 = vmatmul.mubr.msk.bf16.vlgmr.msra.gmra.mrb[20].mxu0 %vm1266_vm3, %v1525_v50  ;;  %v1503_v62 = vmul.f32 0.0, %v2691_v56 }
 0x510   : > { %2556 = vmatprep.mubr.msk.bf16.mxu0 %vm2806_vm2, %v2805_v10 }
 0x55e   : > { %v1508_v58 = vpop.xlane.xlu0 %1507 }
 0x55f   : > { %v1518_v61 = vadd.f32 %v1508_v58, %v1502_v59 }
 0x561   : > { %2692 = vrcp.f32 %v1518_v61 }
 0x566   : > { %v1511_v60 = vpop.xlane.xlu1 %1510 }
 0x567   : > { %v1519_v63 = vadd.f32 %v1511_v60, %v1503_v62 }
 0x569   : > { %2694 = vrcp.f32 %v1519_v63 }
 0x56a   : > { %2696 = vpow2.f32 %v1486_v2 }
 0x56b   : > { %v2693_v20 = vpop.eup %2692  ;;  %2698 = vpow2.f32 %v1488_v15 }
 0x573   : > { %v2695_v7 = vpop.eup %2694 }
 0x574   : > { %v2697_v16 = vpop.eup %2696 }
 0x575   : > { %v1504_v18 = vmul.f32 0.0, %v2697_v16  ;;  %v2699_v19 = vpop.eup %2698 }
 0x576   : > { %v1505_v23 = vmul.f32 0.0, %v2699_v19 }
 0x593   : > { %v1514_v17 = vpop.xlane.xlu0 %1513 }
 0x594   : > { %v1520_v41 = vadd.f32 %v1514_v17, %v1504_v18 }
 0x596   : > { %2700 = vrcp.f32 %v1520_v41  ;;  %v2667_v41 = vld [vmem:[%s2993_s0 + $0x8] sm:$0xff]   ;;  %s2815_s0 = smov 8  }
 0x597   : > { %2547 = vmatpush3.bf16.msra.mxu1 %v2667_v41 }
 0x598   : > { %2560 = vmatprep.subr.bf16.mxu1 %v2805_v10 }
 0x59b   : > { %v1517_v22 = vpop.xlane.xlu1 %1516 }
 0x59c   : > { %v1521_v24 = vadd.f32 %v1517_v22, %v1505_v23 }
 0x59e   : > { %2702 = vrcp.f32 %v1521_v24 }
 0x5a0   : > { %v2701_v28 = vpop.eup %2700 }
 0x5a8   : > { %v2703_v48 = vpop.eup %2702 }
 0x5b9   : > { %v1567_v13 = vpop.f32.mrb[4].mxu1 }
 0x5ba   : > { %v1711_v33 = vadd.f32 %v1567_v13, %v1502_v59  ;;  %v2524_v0 = vpop.f32.mrb[5].mxu1 }
 0x5bb   : > { %v1570_v21 = vpop.f32.mrb[6].mxu1  ;;  %v1613_v1 = vpop.f32.mrb[16].mxu0 }
 0x5bc   : > { %v1719_v3 = vmul.f32 %v2693_v20, %v1711_v33  ;;  %v1712_v4 = vadd.f32 %v1613_v1, %v1503_v62  ;;  %v2525_v5 = vpop.f32.mrb[7].mxu1  ;;  %v2530_v6 = vpop.f32.mrb[17].mxu0 }
 0x5bd   : > { %v1616_v9 = vpop.f32.mrb[18].mxu0 }
 0x5be   : > { %v1720_v12 = vmul.f32 %v2695_v7, %v1712_v4  ;;  %v2531_v32 = vpop.f32.mrb[19].mxu0  ;;  %v1723_v31 = vpack.c.bf16 %v1719_v3, %v1719_v3 }
 0x5c0   : > { %v1730_v38 = vrot.slane %v1723_v31, %v3075_v44  ;;  %v1757_v50 = vpack.c.bf16 %v1720_v12, %v1720_v12 }
 0x5c2   : > { %v1764_v52 = vrot.slane %v1757_v50, %v3075_v44 }
 0x5da   : > { %v1659_v25 = vpop.f32.mrb[8].mxu1 }
 0x5db   : > { %v1713_v26 = vadd.f32 %v1659_v25, %v1504_v18  ;;  %v2536_v27 = vpop.f32.mrb[9].mxu1 }
 0x5dc   : > { %v1662_v29 = vpop.f32.mrb[10].mxu1 }
 0x5dd   : > { %v1721_v34 = vmul.f32 %v2701_v28, %v1713_v26  ;;  %v2537_v35 = vpop.f32.mrb[11].mxu1 }
 0x5df   : > { %v1731_v37 = vpack.c.bf16 %v1721_v34, %v1721_v34 }
 0x5e1   : > { %v1738_v39 = vrot.slane %v1731_v37, %v3075_v44 }
 0x5e2   : > { %v1705_v40 = vpop.f32.mrb[20].mxu0 }
 0x5e3   : > { %v1739_v42 = vcombine.low %v1730_v38, %v1738_v39  ;;  %v1740_v43 = vcombine.high %v1730_v38, %v1738_v39  ;;  %v1714_v45 = vadd.f32 %v1705_v40, %v1505_v23  ;;  %v2542_v46 = vpop.f32.mrb[21].mxu0 }
 0x5e4   : > { %v1708_v49 = vpop.f32.mrb[22].mxu0 }
 0x5e5   : > { %v1722_v8 = vmul.f32 %v2703_v48, %v1714_v45  ;;  %v2543_v30 = vpop.f32.mrb[23].mxu0  ;;  %v1747_v51 = vrot.slane %v1739_v42, %v3079_v47  ;;  %v1754_v54 = vrot.slane %v1740_v43, %v3079_v47  ;;  %v2426_v48 = vld [vmem:[%s3421_s23] ss:$0 sm:$0xff] }
 0x5e7   : > { %v1765_v11 = vpack.c.bf16 %v1722_v8, %v1722_v8  ;;  %v1755_v58 = vcombine.high %v1747_v51, %v2814_v57  ;;  %v1756_v61 = vcombine.high %v1754_v54, %v2814_v57  ;;  %v1795_v62 = vshrl.u32 %v1747_v51, 16 }
 0x5e8   : > { %v1811_v20 = vshrl.u32 %v1754_v54, 16 }
 0x5e9   : > { %v1772_v53 = vrot.slane %v1765_v11, %v3075_v44  ;;  %v1803_v0 = vshrl.u32 %v1755_v58, 16  ;;  %v1819_v6 = vshrl.u32 %v1756_v61, 16  ;;  %v2708_v11 = vld [vmem:[#allocation2] sm:$0xff] }
 0x5eb   : > { %v1773_v55 = vcombine.low %v1764_v52, %v1772_v53  ;;  %v1774_v56 = vcombine.high %v1764_v52, %v1772_v53 }
 0x5ed   : > { %v1781_v59 = vrot.slane %v1773_v55, %v3079_v47  ;;  %v1788_v60 = vrot.slane %v1774_v56, %v3079_v47 }
 0x5ef   : > { %v1789_v63 = vcombine.high %v1781_v59, %v2814_v57  ;;  %v1790_v36 = vcombine.high %v1788_v60, %v2814_v57  ;;  %v1793_v13 = vpack.i.b16 %v1781_v59, %v1747_v51  ;;  %v1796_v33 = vshrl.u32 %v1781_v59, 16 }
 0x5f0   : > { %v1809_v21 = vpack.i.b16 %v1788_v60, %v1754_v54  ;;  %v1812_v1 = vshrl.u32 %v1788_v60, 16  ;;  %v2668_v60 = vld [vmem:[%s3010_s18] sm:$0xff]  }
 0x5f1   : > { %v1797_v2 = vpack.i.b16 %v1796_v33, %v1795_v62  ;;  %v1801_v3 = vpack.i.b16 %v1789_v63, %v1755_v58  ;;  %v1804_v4 = vshrl.u32 %v1789_v63, 16  ;;  %v1817_v5 = vpack.i.b16 %v1790_v36, %v1756_v61  ;;  %2553 = vmatpush3.bf16.msra.mxu0 %v2668_v60  ;;  %v2669_v61 = vld [vmem:[%s3010_s18 + $0x8] sm:$0xff]   ;;  %v2670_v62 = vld [vmem:[%s3024_s27] sm:$0xff]  }
 0x5f2   : > { %v1813_v7 = vpack.i.b16 %v1812_v1, %v1811_v20  ;;  %v1820_v9 = vshrl.u32 %v1790_v36, 16  ;;  %v1823_v12 = vcombine.low %v1793_v13, %v1809_v21  ;;  %2554 = vmatprep.subr.bf16.mxu0 %v2805_v10  ;;  %v2431_v21 = vld [vmem:[%s623_s3] ss:$0 sm:$0xff] }
 0x5f3   : > { %v1805_v32 = vpack.i.b16 %v1804_v4, %v1803_v0  ;;  %v1831_v14 = vcombine.low %v1801_v3, %v1817_v5  ;;  %v2430_v0 = vld [vmem:[%s3422_s24] ss:$0 sm:$0xff]  ;;  %v2671_v4 = vld [vmem:[%s3024_s27 + $0x8] sm:$0xff]   ;;  %v2672_v5 = vld [vmem:[%s3024_s27 + $0x10] sm:$0xff]  }
 0x5f4   : > { %v1821_v15 = vpack.i.b16 %v1820_v9, %v1819_v6  ;;  %v1848_v16 = vcombine.low %v1797_v2, %v1813_v7  ;;  %v1830_v17 = vrot.slane %v1823_v12, %v3075_v44  ;;  %v2673_v6 = vld [vmem:[%s3024_s27 + $0x18] sm:$0xff]   ;;  %v2674_v7 = vld [vmem:[%s3024_s27 + $0x20] sm:$0xff]   ;;  %v2675_v9 = vld [vmem:[%s3024_s27 + $0x28] sm:$0xff]  }
 0x5f5   : > { %v1838_v18 = vrot.slane %v1831_v14, %v3075_v44  ;;  %2555 = vmatpush3.bf16.msra.mxu0 %v2669_v61  ;;  %v2676_v12 = vld [vmem:[%s3024_s27 + $0x30] sm:$0xff]   ;;  %v2432_v14 = vld [vmem:[%s631_s19] ss:$0 sm:$0xff] }
 0x5f6   : > { %v1856_v19 = vcombine.low %v1805_v32, %v1821_v15  ;;  %v1855_v23 = vrot.slane %v1848_v16, %v3075_v44  ;;  %v2677_v32 = vld [vmem:[%s3024_s27 + $0x38] sm:$0xff]  }
 0x5f7   : > { %v1839_v22 = vcombine.low %v1830_v17, %v1838_v18 }
 0x5f8   : > { %v1863_v24 = vrot.slane %v1856_v19, %v3075_v44 }
 0x5f9   : > { %v1846_v25 = vrot.slane %v1839_v22, %v3079_v47 }
 0x5fa   : > { %v1864_v26 = vcombine.low %v1855_v23, %v1863_v24 }
 0x5fb   : > { %v1847_v28 = vcombine.high %v1846_v25, %v2814_v57  ;;  %v1876_v29 = vshrl.u32 %v1846_v25, 16 }
 0x5fc   : > { %v1871_v27 = vrot.slane %v1864_v26, %v3079_v47 }
 0x5fd   : > { %v1882_v39 = vshrl.u32 %v1847_v28, 16 }
 0x5fe   : > { %v1877_v31 = vshrl.u32 %v1871_v27, 16  ;;  %v1872_v34 = vcombine.high %v1871_v27, %v2814_v57  ;;  %v1875_v35 = vpack.i.b16 %v1871_v27, %v1846_v25 }
 0x600   : > { %v1878_v37 = vpack.i.b16 %v1877_v31, %v1876_v29  ;;  %v1881_v38 = vpack.i.b16 %v1872_v34, %v1847_v28  ;;  %v1883_v40 = vshrl.u32 %v1872_v34, 16  ;;  %v2436_v31 = vld [vmem:[%s639_s25] ss:$0 sm:$0xff] }
 0x602   : > { %1885 = vrot.lane.b32.xlu0 %v1878_v37, %s2815_s0  ;;  %1887 = vrot.lane.b32.xlu1 %v1881_v38, %s2816_s13  ;;  %v1884_v44 = vpack.i.b16 %v1883_v40, %v1882_v39 }
 0x606   : > { %1889 = vrot.lane.b32.xlu1 %v1884_v44, %s2817_s29 }
 0x674   : > { %v1886_v47 = vpop.permute.xlu0 %1885  ;;  %v1888_v42 = vpop.permute.xlu1 %1887 }
 0x675   : > { %v1893_v43 = vsel %vm1266_vm3, %v1875_v35, %v1886_v47 }
 0x676   : > { %v1896_v57 = vsel %vm1894_vm6, %v1893_v43, %v1888_v42 }
 0x678   : > { %v1890_v45 = vpop.permute.xlu1 %1889 }
 0x679   : > { %v1899_v46 = vsel %vm1897_vm7, %v1896_v57, %v1890_v45 }
 0x67a   : > { %2549 = vmatmul.mubr.msk.bf16.vlgmr.msra.gmra.mrb[12].mxu1 %vm652_vm1, %v1899_v46 }
 0x67b   : > { %2576 = vmatprep.mubr.msk.bf16.mxu1 %vm2806_vm2, %v2805_v10  ;;  %2561 = vmatpush3.bf16.msra.mxu1 %v2670_v62 }
 0x67c   : > { %2562 = vmatprep.subr.bf16.mxu1 %v2805_v10 }
 0x67f   : > { %2563 = vmatpush3.bf16.msra.mxu1 %v2671_v4 }
 0x680   : > { %2564 = vmatprep.subr.bf16.mxu1 %v2805_v10 }
 0x683   : > { %2565 = vmatpush3.bf16.msra.mxu1 %v2672_v5 }
 0x684   : > { %2566 = vmatprep.subr.bf16.mxu1 %v2805_v10 }
 0x687   : > { %2567 = vmatpush3.bf16.msra.mxu1 %v2673_v6 }
 0x688   : > { %2568 = vmatprep.subr.bf16.mxu1 %v2805_v10 }
 0x68b   : > { %2569 = vmatpush3.bf16.msra.mxu1 %v2674_v7 }
 0x68c   : > { %2570 = vmatprep.subr.bf16.mxu1 %v2805_v10 }
 0x68f   : > { %2571 = vmatpush3.bf16.msra.mxu1 %v2675_v9 }
 0x690   : > { %2572 = vmatprep.subr.bf16.mxu1 %v2805_v10 }
 0x693   : > { %2573 = vmatpush3.bf16.msra.mxu1 %v2676_v12 }
 0x694   : > { %2574 = vmatprep.subr.bf16.mxu1 %v2805_v10 }
 0x697   : > { %2575 = vmatpush3.bf16.msra.mxu1 %v2677_v32 }
 0x74d   : > { %v1959_v49 = vpop.f32.mrb[12].mxu1 }
 0x74e   : > { %v1960_v8 = vadd.f32 %v2426_v48, %v1959_v49  ;;  %v2550_v30 = vpop.f32.mrb[13].mxu1 }
 0x74f   : > { %v1962_v50 = vpop.f32.mrb[14].mxu1 }
 0x750   : > { %v3258_v51 = vadd.f32 %v2708_v11, %v1960_v8  ;;  %v2551_v52 = vpop.f32.mrb[15].mxu1 }
 0x752   : > { %v1968_v53 = vsel %vm652_vm1, %v3258_v51, 0.0 }
 0x753   : > { %1969 = vadd.xlane.f32.xlu0 %v1968_v53 }
 0x7e0   : > { %v1970_v54 = vpop.xlane.xlu0 %1969 }
 0x7e1   : > { %v1971_v55 = vmul.f32 0.03125, %v1970_v54 }
 0x7e3   : > { %v1972_v56 = vsub.f32 %v3258_v51, %v1971_v55 }
 0x7e5   : > { %v1973_v58 = vmul.f32 %v1972_v56, %v1972_v56 }
 0x7e7   : > { %v1974_v59 = vsel %vm652_vm1, %v1973_v58, 0.0 }
 0x7e8   : > { %1975 = vadd.xlane.f32.xlu1 %v1974_v59 }
 0x875   : > { %v1976_v63 = vpop.xlane.xlu1 %1975 }
 0x876   : > { %v1977_v36 = vmul.f32 0.03125, %v1976_v63 }
 0x878   : > { %v1978_v13 = vadd.f32 1e-05, %v1977_v36 }
 0x87a   : > { %2704 = vrsqrt.f32 %v1978_v13 }
 0x884   : > { %v2705_v33 = vpop.eup %2704 }
 0x885   : > { %v1980_v20 = vmul.f32 %v2705_v33, %v1972_v56 }
 0x887   : > { %v1987_v1 = vmul.f32 %v2430_v0, %v1980_v20 }
 0x889   : > { %v1994_v2 = vadd.f32 %v2431_v21, %v1987_v1 }
 0x88b   : > { %v1995_v3 = vpack.c.bf16 %v1994_v2, %v1994_v2 }
 0x88d   : > { %2557 = vmatmul.mubr.msk.bf16.vlgmr.msra.gmra.mrb[24].mxu0 %vm652_vm1, %v1995_v3 }
 0x960   : > { %v2056_v15 = vpop.f32.mrb[24].mxu0 }
 0x961   : > { %v2057_v16 = vadd.f32 %v2432_v14, %v2056_v15  ;;  %v2558_v17 = vpop.f32.mrb[25].mxu0 }
 0x962   : > { %v2059_v18 = vpop.f32.mrb[26].mxu0 }
 0x963   : > { %v2063_v41 = vmul.f32 0.044715, %v2057_v16  ;;  %v2559_v19 = vpop.f32.mrb[27].mxu0  ;;  %v2062_v10 = vmul.f32 0.5, %v2057_v16 }
 0x965   : > { %v2064_v22 = vmul.f32 %v2063_v41, %v2057_v16 }
 0x967   : > { %v2065_v23 = vmul.f32 %v2064_v22, %v2057_v16 }
 0x969   : > { %v2066_v24 = vadd.f32 %v2065_v23, %v2057_v16 }
 0x96b   : > { %v2067_v25 = vmul.f32 0.7978846, %v2066_v24 }
 0x96d   : > { %2706 = vtanh.f32 %v2067_v25 }
 0x977   : > { %v2707_v26 = vpop.eup %2706 }
 0x978   : > { %v2069_v27 = vadd.f32 1.0, %v2707_v26 }
 0x97a   : > { %v2070_v28 = vmul.f32 %v2069_v27, %v2062_v10 }
 0x97c   : > { %v2071_v29 = vpack.c.bf16 %v2070_v28, %v2070_v28 }
 0x97e   : > { %2577 = vmatmul.mubr.bf16.vlgmr.msra.gmra.mrb[16].mxu1 %v2071_v29 }
 0xa50   : > { %2188 = sbr.rel (%p2445_p1) target bundleno = 2649 (0xa59), region = 80 }
 0xa51   : > { %v2177_v34 = vpop.f32.mrb[16].mxu1 }
 0xa52   : > { %v2178_v35 = vadd.f32 %v2436_v31, %v2177_v34  ;;  %v2578_v37 = vpop.f32.mrb[17].mxu1 }
 0xa53   : > { %v2180_v38 = vpop.f32.mrb[18].mxu1 }
 0xa54   : > { %v2183_v39 = vadd.f32 %v2178_v35, %v3258_v51  ;;  %v2579_v40 = vpop.f32.mrb[19].mxu1 }
 0xa56   : > { %2184 = vst.msk [vmem:[#allocation2] sm:$0xff] %vm652_vm1, %v2183_v39  ;;  %v2189_v44 = vpack.c.bf16 (!%p2445_p1), %v2183_v39, %v2183_v39 }
 0xa58   : > { %2191 = vst.msk [vmem:[%s591_s26] sm:$0xf] %vm2190_vm8, %v2189_v44 }
 0xa59 PF: > { %s3424_s30 = sld [smem:[#allocation10_spill]]  ;;  %s3425_s25 = sld [smem:[#allocation7_spill]] }
 0xa5a   : > { %s3427_s29 = sld [smem:[#allocation23_spill]]  ;;  %s2206_s23 = sshll.u32 %s591_s26, 4  ;;  %s2207_s23 = int_to_ptr.vmem [resolvable:$true] %s2206_s23 }
 0xa5b   : > { %s2709_s24 = scalar_lea.vmem %s2207_s23, 64  ;;  %s2818_s18 = smov [#allocation3]  }
 0xa5c   : > { %p2710_p2 = scmp.ne.s32.totalorder %s2207_s23, %s2709_s24  ;;  %s2713_s15 = sshll.u32 %s2818_s18, 4  ;;  %s2714_s15 = int_to_ptr.vmem [resolvable:$false] %s2713_s15 }
 0xa5d   : > { %s2715_s3 = scalar_lea.vmem %s2714_s15, 128  ;;  %p2716_p6 = scmp.lt.s32.totalorder %s2207_s23, %s2714_s15 }
 0xa5e   : > { %p2711_p4 = pnand %p2710_p2, %p2938_p3  ;;  %p2717_p7 = scmp.lt.s32.totalorder %s2715_s3, %s2709_s24 }
 0xa5f   : > { %s2447_s5 = sshll.u32 %s3424_s30, 6  ;;  %s3429_s22 = sand.u32 1, %s3425_s25  }
 0xa60   : > { %s3428_s16 = smov %s3427_s29  ;;  %s3312_s28 = scalar_lea.hbm %s3427_s29, %s2447_s5 }
 0xa61   : > { %s2193_s14 = scalar_lea.sflag [#allocation4], %s3429_s22  ;;  %p2712_p5 = pneg %p2711_p4 }
 0xa62   : > { %p2718_p8 = por %p2717_p7, %p2716_p6 }
 0xa64   : > { %p2719_p10 = pnand %p2718_p8, %p2712_p5 }
 0xa66   : > { %2722 = shalt.err (!%p2719_p10)
}
 0xa67   : > { %s2723_s17 = scalar_lea.hbm %s3312_s28, 64  ;;  %s2727_s27 = scalar_lea.hbm %s3428_s16, 128 }
 0xa68   : > { %p2724_p11 = scmp.ne.s32.totalorder %s3312_s28, %s2723_s17  ;;  %p2728_p0 = scmp.lt.u32.totalorder %s3312_s28, %s3428_s16 }
 0xa69   : > { %p2729_p1 = scmp.lt.u32.totalorder %s2727_s27, %s2723_s17  ;;  %p2731_p4 = scmp.lt.u32.totalorder %s2723_s17, %s3312_s28 }
 0xa6a   : > { %p2725_p12 = pnand %p2724_p11, %p2938_p3 }
 0xa6b   : > { %p2730_p2 = por %p2729_p1, %p2728_p0 }
 0xa6c   : > { %p2726_p13 = pneg %p2725_p12 }
 0xa6d   : > { %p2732_p5 = por %p2731_p4, %p2730_p2 }
 0xa6f   : > { %p2733_p6 = pnand %p2732_p5, %p2726_p13 }
 0xa71   : > { %2736 = shalt.err (!%p2733_p6)
}
 0xa72   : > { %2580 = dma.vmem_to_hbm [thread:$0]  (%p2938_p3), %s2207_s23, 64, %s3312_s28, %s2193_s14  }
 0xa73 PF: > { %s3430_s30 = sld [smem:[#allocation13_spill]]  ;;  %s3431_s25 = sld [smem:[#allocation6_spill]] }
 0xa79   : > { %p2586_p7 = scmp.ge.s32.totalorder %s3430_s30, 2  ;;  %s2218_s0 = sand.u32 1, %s3431_s25  }
 0xa7a   : > { %s2219_s13 = scalar_lea.sflag [#allocation4], %s2218_s0 }
 0xa7b   : > { %p2583_p8 = pnand %p2586_p7, %p2948_p9 }
 0xa7d   : > { %2770 = dma.done.wait (!%p2583_p8), %s2219_s13, 64  }
 0xa7e   : > { %2772 = vsyncadd (!%p2583_p8), %s2219_s13, 4294967232  ;;  %s26_s15 = sadd.s32 1, %s3430_s30   ;;  %s3433_s25 = sld [smem:[#allocation7_spill]] }
 0xa7f   : > { %p23_p10 = scmp.ge.s32.totalorder %s26_s15, 6   ;;  %s3434_s26 = sld [smem:[#allocation8_spill]] }
 0xa80   : > { %s3435_s27 = sld [smem:[#allocation18_spill]]  ;;  %s3436_s28 = sld [smem:[#allocation11_spill]] }
 0xa81   : > { %s3437_s29 = sld [smem:[#allocation12_spill]]  ;;  %s3438_s30 = sld [smem:[#allocation14_spill]] }
 0xa82   : > { %s3439_s14 = sld [smem:[#allocation16_spill]]  ;;  %25 = sbr.rel (!%p23_p10) target bundleno = 11 (0xb), region = 151 }
 0xa89   :  { %2224 = vsyncpa [#allocation4], 1 }
 0xa8a   :  { %2226 = vsyncpa [#allocation4 + $0x1], 1 }

</bundles_post_ra>
